<compile_context>
chip_gen: v7x
topology: tpu7x:2x2x1
jax: 0.10.0
libtpu: 0.0.40
codegen_flags: <defaults>
</compile_context>

<pallas_src>
import functools

import numpy as np
import jax
import jax.numpy as jnp
from jax import lax
from jax.experimental import pallas as pl
from jax.experimental.pallas import tpu as pltpu

_HI = jax.lax.Precision.HIGHEST


# ----------------------------------------------------------------------------
# Static bilinear interpolation matrix (matches torch F.interpolate,
# mode='bilinear', align_corners=False):  out_1d = W @ in_1d
# ----------------------------------------------------------------------------
def _make_interp_matrix(out_size: int, in_size: int) -> np.ndarray:
    W = np.zeros((out_size, in_size), dtype=np.float32)
    scale = in_size / out_size
    for j in range(out_size):
        src = scale * (j + 0.5) - 0.5
        if src < 0.0:
            src = 0.0
        i0 = int(np.floor(src))
        i0 = min(i0, in_size - 1)
        i1 = i0 + 1 if i0 < in_size - 1 else i0
        lam1 = src - i0
        lam0 = 1.0 - lam1
        W[j, i0] += lam0
        W[j, i1] += lam1
    return W


def _vmem_limit(nbytes: int) -> int:
    # Actual need + headroom, capped well below v7x's 64 MiB physical VMEM.
    return int(min(48 * 1024 * 1024, max(24 * 1024 * 1024, nbytes + (8 << 20))))


# ----------------------------------------------------------------------------
# Kernel 1: greedy selection of `num_patches` most-uncertain patch coords.
# Grid = (B,).  u_ref: (1, H, W) VMEM in, coords_ref: (1, NP, 4) SMEM out,
# work_ref: (H, W) VMEM scratch holding the progressively-masked map.
# ----------------------------------------------------------------------------
def _select_kernel(u_ref, coords_ref, work_ref, *, num_patches, eff, half,
                   margin):
    H, W = work_ref.shape
    row_ids = lax.broadcasted_iota(jnp.int32, (H, W), 0)
    col_ids = lax.broadcasted_iota(jnp.int32, (H, W), 1)
    row_iota = lax.broadcasted_iota(jnp.int32, (H, 1), 0)

    work_ref[...] = u_ref[0]

    for i in range(num_patches):
        u = work_ref[...]
        # Hierarchical first-occurrence (row-major) argmax, like np.ma.argmax:
        # per-row lane reduce, then a short sublane reduce over (H, 1) strips.
        row_max = jnp.max(u, axis=1, keepdims=True)                   # (H, 1)
        col_first = jnp.min(jnp.where(u == row_max, col_ids, W),
                            axis=1, keepdims=True)                    # (H, 1)
        m = jnp.max(row_max)
        yc = jnp.min(jnp.where(row_max == m, row_iota, H))
        xc = jnp.min(jnp.where(row_iota == yc, col_first, W))
        # TODO(synk): NaNs in the map / full saturation silently degenerate to
        # (0, 0) instead of torch's host-RNG fallback.

        x1 = jnp.maximum(0, xc - half)
        y1 = jnp.maximum(0, yc - half)
        x2 = jnp.minimum(W, xc + half)
        y2 = jnp.minimum(H, yc + half)

        need_x = (x2 - x1) < eff
        x2n = jnp.where(need_x & (x1 == 0), jnp.minimum(W, x1 + eff), x2)
        x1n = jnp.where(need_x & (x1 != 0), jnp.maximum(0, x2 - eff), x1)
        need_y = (y2 - y1) < eff
        y2n = jnp.where(need_y & (y1 == 0), jnp.minimum(H, y1 + eff), y2)
        y1n = jnp.where(need_y & (y1 != 0), jnp.maximum(0, y2 - eff), y1)

        coords_ref[0, i, 0] = x1n
        coords_ref[0, i, 1] = y1n
        coords_ref[0, i, 2] = x2n
        coords_ref[0, i, 3] = y2n

        mx1 = jnp.maximum(0, x1n - margin)
        my1 = jnp.maximum(0, y1n - margin)
        mx2 = jnp.minimum(W, x2n + margin)
        my2 = jnp.minimum(H, y2n + margin)
        in_box = ((row_ids >= my1) & (row_ids < my2) &
                  (col_ids >= mx1) & (col_ids < mx2))
        work_ref[...] = jnp.where(in_box, -jnp.inf, u)


def select_patch_coords(uncertainty, *, patch_size, num_patches):
    """uncertainty: [B, H, W] float32 -> coords [B, num_patches, 4] int32."""
    B, H, W = uncertainty.shape
    eff = min(patch_size, H // 2, W // 2)
    half = eff // 2
    margin = max(eff // 4, 1)
    kernel = functools.partial(_select_kernel, num_patches=num_patches,
                               eff=eff, half=half, margin=margin)
    cost = pl.CostEstimate(
        flops=int(8 * B * num_patches * H * W),
        transcendentals=0,
        bytes_accessed=int(B * H * W * 4 + B * num_patches * 16))
    return pl.pallas_call(
        kernel,
        out_shape=jax.ShapeDtypeStruct((B, num_patches, 4), jnp.int32),
        grid_spec=pltpu.PrefetchScalarGridSpec(
            num_scalar_prefetch=0,
            grid=(B,),
            in_specs=[pl.BlockSpec((1, H, W), lambda b: (b, 0, 0))],
            out_specs=pl.BlockSpec((1, num_patches, 4), lambda b: (b, 0, 0),
                                   memory_space=pltpu.MemorySpace.SMEM),
            scratch_shapes=[pltpu.VMEM((H, W), jnp.float32)],
        ),
        compiler_params=pltpu.CompilerParams(
            dimension_semantics=("parallel",),
            vmem_limit_bytes=_vmem_limit(4 * H * W * 4)),
        cost_estimate=cost,
    )(uncertainty.astype(jnp.float32))


# ----------------------------------------------------------------------------
# Kernel 2: crop + bilinear resize.  Grid = (B,); all NP patches of one batch
# element are processed inside the kernel (static unrolled loop), so the image
# block is DMA'd once per batch element and there is a single pipeline step
# per image.
#   coords_ref: (B, NP, 4) int32, scalar-prefetched into SMEM
#   wy_ref    : (P, eff)   static row-interp matrix (resident)
#   img_ref   : (1, C, H, W) image block
#   out_ref   : (1, NP, P, C*P) lane-dense output slab (float32)
#
# Per patch: crop eff rows at y1 (dynamic sublane slice), build the column
# interp weights (W, P) on the VPU at the dynamic x1 offset, then
#   s  = rows (C*eff, W) @ wx (W, P)          (one MXU dot, batched over C)
#   s2 = gather channels to (eff, C*P)        (aligned slices + lane concat)
#   out = wy (P, eff) @ s2 (eff, C*P)         (one MXU dot, N = C*P)
# ----------------------------------------------------------------------------
def _resize_kernel(coords_ref, wy_ref, img_ref, out_ref, *, num_patches, eff):
    C = img_ref.shape[1]
    W = img_ref.shape[3]
    P = wy_ref.shape[0]
    b = pl.program_id(0)

    wy = wy_ref[...]                                            # (P, eff) f32

    # Loop-invariant pieces of the column weights (hoisted out of the loop).
    scale = eff / P
    q_rel = (lax.broadcasted_iota(jnp.int32, (1, P), 1).astype(jnp.float32)
             + 0.5) * scale - 0.5
    q_rel = jnp.clip(q_rel, 0.0, float(eff - 1))                # (1, P)
    k_abs = lax.broadcasted_iota(jnp.int32, (W, 1), 0).astype(jnp.float32)

    for n in range(num_patches):
        x1 = coords_ref[b, n, 0]
        y1 = coords_ref[b, n, 1]

        # Closed-form bilinear column weights placed at offset x1.  VPU-only;
        # exactly reproduces _make_interp_matrix(P, eff) scattered at x1.
        src = q_rel + x1.astype(jnp.float32)                    # (1, P)
        wx = jnp.maximum(0.0, 1.0 - jnp.abs(src - k_abs))       # (W, P)

        rows = img_ref[0, :, pl.ds(y1, eff), :]                 # (C, eff, W)

        if eff % 8 == 0 or C == 1:
            # (C, eff, W) -> (C*eff, W) is a layout no-op when eff % 8 == 0.
            lhs = rows.reshape(C * eff, W)
            s = jnp.dot(lhs, wx, preferred_element_type=jnp.float32,
                        precision=_HI)                          # (C*eff, P)
            if C == 1:
                s2 = s
            else:
                s2 = jnp.concatenate(
                    [s[c * eff:(c + 1) * eff, :] for c in range(C)],
                    axis=-1)                                     # (eff, C*P)
            out = jnp.dot(wy, s2, preferred_element_type=jnp.float32,
                          precision=_HI)                         # (P, C*P)
        else:
            # Fallback for sublane-unaligned eff: per-channel dots.
            outs = []
            for c in range(C):
                s_c = jnp.dot(rows[c], wx,
                              preferred_element_type=jnp.float32,
                              precision=_HI)                     # (eff, P)
                outs.append(jnp.dot(wy, s_c,
                                    preferred_element_type=jnp.float32,
                                    precision=_HI))
            out = outs[0] if C == 1 else jnp.concatenate(outs, axis=-1)

        out_ref[0, n] = out.astype(out_ref.dtype)


def extract_patches(coords, wy, images, *, eff, patch_size, num_patches):
    B, C, H, W = images.shape
    P = patch_size
    NP = num_patches
    itemsize = images.dtype.itemsize
    kernel = functools.partial(_resize_kernel, num_patches=NP, eff=eff)
    flops = int(2 * B * NP * (C * eff * W * P + P * eff * C * P))
    bytes_accessed = int(B * C * H * W * itemsize + B * NP * P * C * P * 4
                         + B * NP * 16 + P * eff * 4)
    vmem_need = int(2 * C * H * W * itemsize          # double-buffered image
                    + 2 * NP * P * C * P * 4          # double-buffered out slab
                    + P * eff * 4                     # wy
                    + C * eff * W * 4 + W * P * 4 + C * eff * P * 4)  # temps
    cost = pl.CostEstimate(flops=flops, transcendentals=0,
                           bytes_accessed=bytes_accessed)
    return pl.pallas_call(
        kernel,
        out_shape=jax.ShapeDtypeStruct((B, NP, P, C * P), jnp.float32),
        grid_spec=pltpu.PrefetchScalarGridSpec(
            num_scalar_prefetch=1,
            grid=(B,),
            in_specs=[
                pl.BlockSpec((P, eff), lambda b, c: (0, 0)),
                pl.BlockSpec((1, C, H, W), lambda b, c: (b, 0, 0, 0)),
            ],
            out_specs=pl.BlockSpec((1, NP, P, C * P),
                                   lambda b, c: (b, 0, 0, 0)),
        ),
        compiler_params=pltpu.CompilerParams(
            dimension_semantics=("parallel",),
            vmem_limit_bytes=_vmem_limit(vmem_need)),
        cost_estimate=cost,
    )(coords, wy, images)


@functools.partial(jax.jit, static_argnums=(2, 3))
def _forward(images, uncertainty_maps, patch_size, num_patches):
    B, C, H, W = images.shape
    P, NP = patch_size, num_patches
    eff = min(P, H // 2, W // 2)

    u = uncertainty_maps[:, 0].astype(jnp.float32)                   # [B,H,W]
    coords = select_patch_coords(u, patch_size=P, num_patches=NP)    # i32

    wy = jnp.asarray(_make_interp_matrix(P, eff))                    # (P, eff)
    patches_flat = extract_patches(coords, wy, images, eff=eff,
                                   patch_size=P, num_patches=NP)     # (B,NP,P,C*P)
    # Small output: one XLA reshape/transpose back to (B, NP, C, P, P).
    patches = patches_flat.reshape(B, NP, P, C, P).transpose(0, 1, 3, 2, 4)
    return patches, coords.astype(jnp.float32)


class ProgressivePatchExtractorPallas:
    def __init__(self, patch_size=64, num_patches=3, input_size=256):
        self.patch_size = patch_size
        self.num_patches = num_patches
        self.input_size = input_size  # unused in forward (parity with torch)

    def __call__(self, images, uncertainty_maps):
        return _forward(images, uncertainty_maps, self.patch_size,
                        self.num_patches)


# ----------------------------------------------------------------------------
# Pure-numpy reference mirroring the torch forward (greedy path).
# ----------------------------------------------------------------------------
def reference_forward(images, uncertainty, patch_size, num_patches):
    imgs = np.asarray(images, dtype=np.float32)
    u = np.asarray(uncertainty, dtype=np.float32)
    B, C, H, W = imgs.shape
    eff = min(patch_size, H // 2, W // 2)
    half = eff // 2
    margin = max(eff // 4, 1)
    interp = _make_interp_matrix(patch_size, eff)
    patches = np.zeros((B, num_patches, C, patch_size, patch_size), np.float32)
    coords_out = np.zeros((B, num_patches, 4), np.float32)
    for b in range(B):
        umap = u[b, 0]
        mask = np.zeros_like(umap, dtype=bool)
        coords = []
        for _ in range(num_patches):
            mm = np.where(mask, -np.inf, umap)
            yc, xc = np.unravel_index(np.argmax(mm), mm.shape)
            x1 = max(0, xc - half); y1 = max(0, yc - half)
            x2 = min(W, xc + half); y2 = min(H, yc + half)
            if x2 - x1 < eff:
                if x1 == 0:
                    x2 = min(W, x1 + eff)
                else:
                    x1 = max(0, x2 - eff)
            if y2 - y1 < eff:
                if y1 == 0:
                    y2 = min(H, y1 + eff)
                else:
                    y1 = max(0, y2 - eff)
            coords.append((int(x1), int(y1), int(x2), int(y2)))
            mask[max(0, y1 - margin):min(H, y2 + margin),
                 max(0, x1 - margin):min(W, x2 + margin)] = True
        for i, (x1, y1, x2, y2) in enumerate(coords):
            crop = imgs[b, :, y1:y2, x1:x2]
            patches[b, i] = np.einsum('ps,csk,qk->cpq', interp, crop, interp)
            coords_out[b, i] = [x1, y1, x2, y2]
    return patches, coords_out


if __name__ == "__main__":
    key = jax.random.PRNGKey(0)
    k1, k2 = jax.random.split(key)
    B, C, H, W = 2, 4, 16, 16
    patch_size, num_patches = 12, 3

    images = jax.random.normal(k1, (B, C, H, W), dtype=jnp.float32)
    uncertainty_maps = jax.random.uniform(k2, (B, 1, H, W), dtype=jnp.float32)

    extractor = ProgressivePatchExtractorPallas(patch_size=patch_size,
                                                num_patches=num_patches,
                                                input_size=H)
    patches, coords = extractor(images, uncertainty_maps)
    patches = jax.block_until_ready(patches)
    coords = jax.block_until_ready(coords)

    assert patches.shape == (B, num_patches, C, patch_size, patch_size)
    assert coords.shape == (B, num_patches, 4)

    ref_p, ref_c = reference_forward(np.asarray(images),
                                     np.asarray(uncertainty_maps),
                                     patch_size, num_patches)
    np.testing.assert_allclose(np.asarray(coords), ref_c, rtol=0, atol=0)
    np.testing.assert_allclose(np.asarray(patches), ref_p, rtol=1e-4, atol=1e-5)

    print("KERNEL_OK")
</pallas_src>

<mosaic_0001>
module attributes {stable_mosaic.version = 11 : i64} {
  func.func @_select_kernel(%arg0: i32, %arg1: memref<1x16x16xf32, #tpu.memory_space<vmem>>, %arg2: memref<1x3x4xi32, #tpu.memory_space<smem>>, %arg3: memref<16x16xf32, #tpu.memory_space<vmem>>) attributes {dimension_semantics = [#tpu.dimension_semantics<parallel>], iteration_bounds = array<i64: 2>, scalar_prefetch = 0 : i64, scratch_operands = 1 : i64, tpu.core_type = #tpu.core_type<tc>, window_params = [{transform_indices = @transform_0, window_bounds = array<i64: 1, 16, 16>}, {transform_indices = @transform_1, window_bounds = array<i64: 1, 3, 4>}]} {
    %0 = tpu.iota {dimensions = array<i32: 0>} : vector<16x16xi32>
    %1 = tpu.iota {dimensions = array<i32: 1>} : vector<16x16xi32>
    %2 = tpu.iota {dimensions = array<i32: 0>} : vector<16x1xi32>
    %c0 = arith.constant 0 : index
    %c0_0 = arith.constant 0 : index
    %c0_1 = arith.constant 0 : index
    %3 = vector.load %arg1[%c0, %c0_0, %c0_1] : memref<1x16x16xf32, #tpu.memory_space<vmem>>, vector<1x16x16xf32>
    %4 = vector.shape_cast %3 : vector<1x16x16xf32> to vector<16x16xf32>
    %c0_2 = arith.constant 0 : index
    %c0_3 = arith.constant 0 : index
    %5 = vector.load %arg3[%c0_2, %c0_3] : memref<16x16xf32, #tpu.memory_space<vmem>>, vector<16x16xf32>
    tpu.vector_store %arg3[%c0_2, %c0_3], %4 {strides = array<i32>} : memref<16x16xf32, #tpu.memory_space<vmem>>, vector<16x16xf32>,
    %c0_4 = arith.constant 0 : index
    %c0_5 = arith.constant 0 : index
    %6 = vector.load %arg3[%c0_4, %c0_5] : memref<16x16xf32, #tpu.memory_space<vmem>>, vector<16x16xf32>
    %cst = arith.constant dense<0xFF800000> : vector<16xf32>
    %7 = vector.multi_reduction <maximumf>, %6, %cst [1] : vector<16x16xf32> to vector<16xf32>
    %8 = vector.shape_cast %7 : vector<16xf32> to vector<16x1xf32>
    %9 = vector.broadcast %8 : vector<16x1xf32> to vector<16x16xf32>
    %10 = arith.cmpf oeq, %6, %9 : vector<16x16xf32>
    %c16_i32 = arith.constant 16 : i32
    %11 = vector.broadcast %c16_i32 : i32 to vector<16x16xi32>
    %12 = arith.select %10, %1, %11 : vector<16x16xi1>, vector<16x16xi32>
    %cst_6 = arith.constant dense<2147483647> : vector<16xi32>
    %13 = vector.multi_reduction <minsi>, %12, %cst_6 [1] : vector<16x16xi32> to vector<16xi32>
    %14 = vector.shape_cast %13 : vector<16xi32> to vector<16x1xi32>
    %15 = vector.shape_cast %8 : vector<16x1xf32> to vector<1x16x1xf32>
    %cst_7 = arith.constant dense<0xFF800000> : vector<1xf32>
    %16 = vector.multi_reduction <maximumf>, %15, %cst_7 [1, 2] : vector<1x16x1xf32> to vector<1xf32>
    %17 = vector.shape_cast %16 : vector<1xf32> to vector<1x1x1xf32>
    %18 = vector.extract %17[0, 0, 0] : f32 from vector<1x1x1xf32>
    %19 = vector.broadcast %18 : f32 to vector<16x1xf32>
    %20 = arith.cmpf oeq, %8, %19 : vector<16x1xf32>
    %c16_i32_8 = arith.constant 16 : i32
    %21 = vector.broadcast %c16_i32_8 : i32 to vector<16x1xi32>
    %22 = arith.select %20, %2, %21 : vector<16x1xi1>, vector<16x1xi32>
    %23 = vector.shape_cast %22 : vector<16x1xi32> to vector<1x16x1xi32>
    %cst_9 = arith.constant dense<2147483647> : vector<1xi32>
    %24 = vector.multi_reduction <minsi>, %23, %cst_9 [1, 2] : vector<1x16x1xi32> to vector<1xi32>
    %25 = vector.shape_cast %24 : vector<1xi32> to vector<1x1x1xi32>
    %26 = vector.extract %25[0, 0, 0] : i32 from vector<1x1x1xi32>
    %27 = vector.broadcast %26 : i32 to vector<16x1xi32>
    %28 = arith.cmpi eq, %2, %27 : vector<16x1xi32>
    %c16_i32_10 = arith.constant 16 : i32
    %29 = vector.broadcast %c16_i32_10 : i32 to vector<16x1xi32>
    %30 = arith.select %28, %14, %29 : vector<16x1xi1>, vector<16x1xi32>
    %31 = vector.shape_cast %30 : vector<16x1xi32> to vector<1x16x1xi32>
    %cst_11 = arith.constant dense<2147483647> : vector<1xi32>
    %32 = vector.multi_reduction <minsi>, %31, %cst_11 [1, 2] : vector<1x16x1xi32> to vector<1xi32>
    %33 = vector.shape_cast %32 : vector<1xi32> to vector<1x1x1xi32>
    %34 = vector.extract %33[0, 0, 0] : i32 from vector<1x1x1xi32>
    %c4_i32 = arith.constant 4 : i32
    %35 = arith.subi %34, %c4_i32 : i32
    %c0_i32 = arith.constant 0 : i32
    %36 = arith.maxsi %c0_i32, %35 : i32
    %c4_i32_12 = arith.constant 4 : i32
    %37 = arith.subi %26, %c4_i32_12 : i32
    %c0_i32_13 = arith.constant 0 : i32
    %38 = arith.maxsi %c0_i32_13, %37 : i32
    %c4_i32_14 = arith.constant 4 : i32
    %39 = arith.addi %34, %c4_i32_14 : i32
    %c16_i32_15 = arith.constant 16 : i32
    %40 = arith.minsi %c16_i32_15, %39 : i32
    %c4_i32_16 = arith.constant 4 : i32
    %41 = arith.addi %26, %c4_i32_16 : i32
    %c16_i32_17 = arith.constant 16 : i32
    %42 = arith.minsi %c16_i32_17, %41 : i32
    %43 = arith.subi %40, %36 : i32
    %c8_i32 = arith.constant 8 : i32
    %44 = arith.cmpi slt, %43, %c8_i32 : i32
    %c0_i32_18 = arith.constant 0 : i32
    %45 = arith.cmpi eq, %36, %c0_i32_18 : i32
    %46 = arith.andi %44, %45 : i1
    %c8_i32_19 = arith.constant 8 : i32
    %47 = arith.addi %36, %c8_i32_19 : i32
    %c16_i32_20 = arith.constant 16 : i32
    %48 = arith.minsi %c16_i32_20, %47 : i32
    %49 = arith.select %46, %48, %40 : i32
    %c0_i32_21 = arith.constant 0 : i32
    %50 = arith.cmpi ne, %36, %c0_i32_21 : i32
    %51 = arith.andi %44, %50 : i1
    %c8_i32_22 = arith.constant 8 : i32
    %52 = arith.subi %40, %c8_i32_22 : i32
    %c0_i32_23 = arith.constant 0 : i32
    %53 = arith.maxsi %c0_i32_23, %52 : i32
    %54 = arith.select %51, %53, %36 : i32
    %55 = arith.subi %42, %38 : i32
    %c8_i32_24 = arith.constant 8 : i32
    %56 = arith.cmpi slt, %55, %c8_i32_24 : i32
    %c0_i32_25 = arith.constant 0 : i32
    %57 = arith.cmpi eq, %38, %c0_i32_25 : i32
    %58 = arith.andi %56, %57 : i1
    %c8_i32_26 = arith.constant 8 : i32
    %59 = arith.addi %38, %c8_i32_26 : i32
    %c16_i32_27 = arith.constant 16 : i32
    %60 = arith.minsi %c16_i32_27, %59 : i32
    %61 = arith.select %58, %60, %42 : i32
    %c0_i32_28 = arith.constant 0 : i32
    %62 = arith.cmpi ne, %38, %c0_i32_28 : i32
    %63 = arith.andi %56, %62 : i1
    %c8_i32_29 = arith.constant 8 : i32
    %64 = arith.subi %42, %c8_i32_29 : i32
    %c0_i32_30 = arith.constant 0 : i32
    %65 = arith.maxsi %c0_i32_30, %64 : i32
    %66 = arith.select %63, %65, %38 : i32
    %c0_31 = arith.constant 0 : index
    %c0_32 = arith.constant 0 : index
    %c0_33 = arith.constant 0 : index
    %67 = memref.load %arg2[%c0_31, %c0_32, %c0_33] : memref<1x3x4xi32, #tpu.memory_space<smem>>
    memref.store %54, %arg2[%c0_31, %c0_32, %c0_33] : memref<1x3x4xi32, #tpu.memory_space<smem>>
    %c0_34 = arith.constant 0 : index
    %c0_35 = arith.constant 0 : index
    %c1 = arith.constant 1 : index
    %68 = memref.load %arg2[%c0_34, %c0_35, %c1] : memref<1x3x4xi32, #tpu.memory_space<smem>>
    memref.store %66, %arg2[%c0_34, %c0_35, %c1] : memref<1x3x4xi32, #tpu.memory_space<smem>>
    %c0_36 = arith.constant 0 : index
    %c0_37 = arith.constant 0 : index
    %c2 = arith.constant 2 : index
    %69 = memref.load %arg2[%c0_36, %c0_37, %c2] : memref<1x3x4xi32, #tpu.memory_space<smem>>
    memref.store %49, %arg2[%c0_36, %c0_37, %c2] : memref<1x3x4xi32, #tpu.memory_space<smem>>
    %c0_38 = arith.constant 0 : index
    %c0_39 = arith.constant 0 : index
    %c3 = arith.constant 3 : index
    %70 = memref.load %arg2[%c0_38, %c0_39, %c3] : memref<1x3x4xi32, #tpu.memory_space<smem>>
    memref.store %61, %arg2[%c0_38, %c0_39, %c3] : memref<1x3x4xi32, #tpu.memory_space<smem>>
    %c2_i32 = arith.constant 2 : i32
    %71 = arith.subi %54, %c2_i32 : i32
    %c0_i32_40 = arith.constant 0 : i32
    %72 = arith.maxsi %c0_i32_40, %71 : i32
    %c2_i32_41 = arith.constant 2 : i32
    %73 = arith.subi %66, %c2_i32_41 : i32
    %c0_i32_42 = arith.constant 0 : i32
    %74 = arith.maxsi %c0_i32_42, %73 : i32
    %c2_i32_43 = arith.constant 2 : i32
    %75 = arith.addi %49, %c2_i32_43 : i32
    %c16_i32_44 = arith.constant 16 : i32
    %76 = arith.minsi %c16_i32_44, %75 : i32
    %c2_i32_45 = arith.constant 2 : i32
    %77 = arith.addi %61, %c2_i32_45 : i32
    %c16_i32_46 = arith.constant 16 : i32
    %78 = arith.minsi %c16_i32_46, %77 : i32
    %79 = vector.broadcast %74 : i32 to vector<16x16xi32>
    %80 = arith.cmpi sge, %0, %79 : vector<16x16xi32>
    %81 = vector.broadcast %78 : i32 to vector<16x16xi32>
    %82 = arith.cmpi slt, %0, %81 : vector<16x16xi32>
    %83 = arith.andi %80, %82 : vector<16x16xi1>
    %84 = vector.broadcast %72 : i32 to vector<16x16xi32>
    %85 = arith.cmpi sge, %1, %84 : vector<16x16xi32>
    %86 = arith.andi %83, %85 : vector<16x16xi1>
    %87 = vector.broadcast %76 : i32 to vector<16x16xi32>
    %88 = arith.cmpi slt, %1, %87 : vector<16x16xi32>
    %89 = arith.andi %86, %88 : vector<16x16xi1>
    %cst_47 = arith.constant 0xFF800000 : f32
    %90 = vector.broadcast %cst_47 : f32 to vector<16x16xf32>
    %91 = arith.select %89, %90, %6 : vector<16x16xi1>, vector<16x16xf32>
    %c0_48 = arith.constant 0 : index
    %c0_49 = arith.constant 0 : index
    %92 = vector.load %arg3[%c0_48, %c0_49] : memref<16x16xf32, #tpu.memory_space<vmem>>, vector<16x16xf32>
    tpu.vector_store %arg3[%c0_48, %c0_49], %91 {strides = array<i32>} : memref<16x16xf32, #tpu.memory_space<vmem>>, vector<16x16xf32>,
    %c0_50 = arith.constant 0 : index
    %c0_51 = arith.constant 0 : index
    %93 = vector.load %arg3[%c0_50, %c0_51] : memref<16x16xf32, #tpu.memory_space<vmem>>, vector<16x16xf32>
    %cst_52 = arith.constant dense<0xFF800000> : vector<16xf32>
    %94 = vector.multi_reduction <maximumf>, %93, %cst_52 [1] : vector<16x16xf32> to vector<16xf32>
    %95 = vector.shape_cast %94 : vector<16xf32> to vector<16x1xf32>
    %96 = vector.broadcast %95 : vector<16x1xf32> to vector<16x16xf32>
    %97 = arith.cmpf oeq, %93, %96 : vector<16x16xf32>
    %c16_i32_53 = arith.constant 16 : i32
    %98 = vector.broadcast %c16_i32_53 : i32 to vector<16x16xi32>
    %99 = arith.select %97, %1, %98 : vector<16x16xi1>, vector<16x16xi32>
    %cst_54 = arith.constant dense<2147483647> : vector<16xi32>
    %100 = vector.multi_reduction <minsi>, %99, %cst_54 [1] : vector<16x16xi32> to vector<16xi32>
    %101 = vector.shape_cast %100 : vector<16xi32> to vector<16x1xi32>
    %102 = vector.shape_cast %95 : vector<16x1xf32> to vector<1x16x1xf32>
    %cst_55 = arith.constant dense<0xFF800000> : vector<1xf32>
    %103 = vector.multi_reduction <maximumf>, %102, %cst_55 [1, 2] : vector<1x16x1xf32> to vector<1xf32>
    %104 = vector.shape_cast %103 : vector<1xf32> to vector<1x1x1xf32>
    %105 = vector.extract %104[0, 0, 0] : f32 from vector<1x1x1xf32>
    %106 = vector.broadcast %105 : f32 to vector<16x1xf32>
    %107 = arith.cmpf oeq, %95, %106 : vector<16x1xf32>
    %c16_i32_56 = arith.constant 16 : i32
    %108 = vector.broadcast %c16_i32_56 : i32 to vector<16x1xi32>
    %109 = arith.select %107, %2, %108 : vector<16x1xi1>, vector<16x1xi32>
    %110 = vector.shape_cast %109 : vector<16x1xi32> to vector<1x16x1xi32>
    %cst_57 = arith.constant dense<2147483647> : vector<1xi32>
    %111 = vector.multi_reduction <minsi>, %110, %cst_57 [1, 2] : vector<1x16x1xi32> to vector<1xi32>
    %112 = vector.shape_cast %111 : vector<1xi32> to vector<1x1x1xi32>
    %113 = vector.extract %112[0, 0, 0] : i32 from vector<1x1x1xi32>
    %114 = vector.broadcast %113 : i32 to vector<16x1xi32>
    %115 = arith.cmpi eq, %2, %114 : vector<16x1xi32>
    %c16_i32_58 = arith.constant 16 : i32
    %116 = vector.broadcast %c16_i32_58 : i32 to vector<16x1xi32>
    %117 = arith.select %115, %101, %116 : vector<16x1xi1>, vector<16x1xi32>
    %118 = vector.shape_cast %117 : vector<16x1xi32> to vector<1x16x1xi32>
    %cst_59 = arith.constant dense<2147483647> : vector<1xi32>
    %119 = vector.multi_reduction <minsi>, %118, %cst_59 [1, 2] : vector<1x16x1xi32> to vector<1xi32>
    %120 = vector.shape_cast %119 : vector<1xi32> to vector<1x1x1xi32>
    %121 = vector.extract %120[0, 0, 0] : i32 from vector<1x1x1xi32>
    %c4_i32_60 = arith.constant 4 : i32
    %122 = arith.subi %121, %c4_i32_60 : i32
    %c0_i32_61 = arith.constant 0 : i32
    %123 = arith.maxsi %c0_i32_61, %122 : i32
    %c4_i32_62 = arith.constant 4 : i32
    %124 = arith.subi %113, %c4_i32_62 : i32
    %c0_i32_63 = arith.constant 0 : i32
    %125 = arith.maxsi %c0_i32_63, %124 : i32
    %c4_i32_64 = arith.constant 4 : i32
    %126 = arith.addi %121, %c4_i32_64 : i32
    %c16_i32_65 = arith.constant 16 : i32
    %127 = arith.minsi %c16_i32_65, %126 : i32
    %c4_i32_66 = arith.constant 4 : i32
    %128 = arith.addi %113, %c4_i32_66 : i32
    %c16_i32_67 = arith.constant 16 : i32
    %129 = arith.minsi %c16_i32_67, %128 : i32
    %130 = arith.subi %127, %123 : i32
    %c8_i32_68 = arith.constant 8 : i32
    %131 = arith.cmpi slt, %130, %c8_i32_68 : i32
    %c0_i32_69 = arith.constant 0 : i32
    %132 = arith.cmpi eq, %123, %c0_i32_69 : i32
    %133 = arith.andi %131, %132 : i1
    %c8_i32_70 = arith.constant 8 : i32
    %134 = arith.addi %123, %c8_i32_70 : i32
    %c16_i32_71 = arith.constant 16 : i32
    %135 = arith.minsi %c16_i32_71, %134 : i32
    %136 = arith.select %133, %135, %127 : i32
    %c0_i32_72 = arith.constant 0 : i32
    %137 = arith.cmpi ne, %123, %c0_i32_72 : i32
    %138 = arith.andi %131, %137 : i1
    %c8_i32_73 = arith.constant 8 : i32
    %139 = arith.subi %127, %c8_i32_73 : i32
    %c0_i32_74 = arith.constant 0 : i32
    %140 = arith.maxsi %c0_i32_74, %139 : i32
    %141 = arith.select %138, %140, %123 : i32
    %142 = arith.subi %129, %125 : i32
    %c8_i32_75 = arith.constant 8 : i32
    %143 = arith.cmpi slt, %142, %c8_i32_75 : i32
    %c0_i32_76 = arith.constant 0 : i32
    %144 = arith.cmpi eq, %125, %c0_i32_76 : i32
    %145 = arith.andi %143, %144 : i1
    %c8_i32_77 = arith.constant 8 : i32
    %146 = arith.addi %125, %c8_i32_77 : i32
    %c16_i32_78 = arith.constant 16 : i32
    %147 = arith.minsi %c16_i32_78, %146 : i32
    %148 = arith.select %145, %147, %129 : i32
    %c0_i32_79 = arith.constant 0 : i32
    %149 = arith.cmpi ne, %125, %c0_i32_79 : i32
    %150 = arith.andi %143, %149 : i1
    %c8_i32_80 = arith.constant 8 : i32
    %151 = arith.subi %129, %c8_i32_80 : i32
    %c0_i32_81 = arith.constant 0 : i32
    %152 = arith.maxsi %c0_i32_81, %151 : i32
    %153 = arith.select %150, %152, %125 : i32
    %c0_82 = arith.constant 0 : index
    %c1_83 = arith.constant 1 : index
    %c0_84 = arith.constant 0 : index
    %154 = memref.load %arg2[%c0_82, %c1_83, %c0_84] : memref<1x3x4xi32, #tpu.memory_space<smem>>
    memref.store %141, %arg2[%c0_82, %c1_83, %c0_84] : memref<1x3x4xi32, #tpu.memory_space<smem>>
    %c0_85 = arith.constant 0 : index
    %c1_86 = arith.constant 1 : index
    %c1_87 = arith.constant 1 : index
    %155 = memref.load %arg2[%c0_85, %c1_86, %c1_87] : memref<1x3x4xi32, #tpu.memory_space<smem>>
    memref.store %153, %arg2[%c0_85, %c1_86, %c1_87] : memref<1x3x4xi32, #tpu.memory_space<smem>>
    %c0_88 = arith.constant 0 : index
    %c1_89 = arith.constant 1 : index
    %c2_90 = arith.constant 2 : index
    %156 = memref.load %arg2[%c0_88, %c1_89, %c2_90] : memref<1x3x4xi32, #tpu.memory_space<smem>>
    memref.store %136, %arg2[%c0_88, %c1_89, %c2_90] : memref<1x3x4xi32, #tpu.memory_space<smem>>
    %c0_91 = arith.constant 0 : index
    %c1_92 = arith.constant 1 : index
    %c3_93 = arith.constant 3 : index
    %157 = memref.load %arg2[%c0_91, %c1_92, %c3_93] : memref<1x3x4xi32, #tpu.memory_space<smem>>
    memref.store %148, %arg2[%c0_91, %c1_92, %c3_93] : memref<1x3x4xi32, #tpu.memory_space<smem>>
    %c2_i32_94 = arith.constant 2 : i32
    %158 = arith.subi %141, %c2_i32_94 : i32
    %c0_i32_95 = arith.constant 0 : i32
    %159 = arith.maxsi %c0_i32_95, %158 : i32
    %c2_i32_96 = arith.constant 2 : i32
    %160 = arith.subi %153, %c2_i32_96 : i32
    %c0_i32_97 = arith.constant 0 : i32
    %161 = arith.maxsi %c0_i32_97, %160 : i32
    %c2_i32_98 = arith.constant 2 : i32
    %162 = arith.addi %136, %c2_i32_98 : i32
    %c16_i32_99 = arith.constant 16 : i32
    %163 = arith.minsi %c16_i32_99, %162 : i32
    %c2_i32_100 = arith.constant 2 : i32
    %164 = arith.addi %148, %c2_i32_100 : i32
    %c16_i32_101 = arith.constant 16 : i32
    %165 = arith.minsi %c16_i32_101, %164 : i32
    %166 = vector.broadcast %161 : i32 to vector<16x16xi32>
    %167 = arith.cmpi sge, %0, %166 : vector<16x16xi32>
    %168 = vector.broadcast %165 : i32 to vector<16x16xi32>
    %169 = arith.cmpi slt, %0, %168 : vector<16x16xi32>
    %170 = arith.andi %167, %169 : vector<16x16xi1>
    %171 = vector.broadcast %159 : i32 to vector<16x16xi32>
    %172 = arith.cmpi sge, %1, %171 : vector<16x16xi32>
    %173 = arith.andi %170, %172 : vector<16x16xi1>
    %174 = vector.broadcast %163 : i32 to vector<16x16xi32>
    %175 = arith.cmpi slt, %1, %174 : vector<16x16xi32>
    %176 = arith.andi %173, %175 : vector<16x16xi1>
    %cst_102 = arith.constant 0xFF800000 : f32
    %177 = vector.broadcast %cst_102 : f32 to vector<16x16xf32>
    %178 = arith.select %176, %177, %93 : vector<16x16xi1>, vector<16x16xf32>
    %c0_103 = arith.constant 0 : index
    %c0_104 = arith.constant 0 : index
    %179 = vector.load %arg3[%c0_103, %c0_104] : memref<16x16xf32, #tpu.memory_space<vmem>>, vector<16x16xf32>
    tpu.vector_store %arg3[%c0_103, %c0_104], %178 {strides = array<i32>} : memref<16x16xf32, #tpu.memory_space<vmem>>, vector<16x16xf32>,
    %c0_105 = arith.constant 0 : index
    %c0_106 = arith.constant 0 : index
    %180 = vector.load %arg3[%c0_105, %c0_106] : memref<16x16xf32, #tpu.memory_space<vmem>>, vector<16x16xf32>
    %cst_107 = arith.constant dense<0xFF800000> : vector<16xf32>
    %181 = vector.multi_reduction <maximumf>, %180, %cst_107 [1] : vector<16x16xf32> to vector<16xf32>
    %182 = vector.shape_cast %181 : vector<16xf32> to vector<16x1xf32>
    %183 = vector.broadcast %182 : vector<16x1xf32> to vector<16x16xf32>
    %184 = arith.cmpf oeq, %180, %183 : vector<16x16xf32>
    %c16_i32_108 = arith.constant 16 : i32
    %185 = vector.broadcast %c16_i32_108 : i32 to vector<16x16xi32>
    %186 = arith.select %184, %1, %185 : vector<16x16xi1>, vector<16x16xi32>
    %cst_109 = arith.constant dense<2147483647> : vector<16xi32>
    %187 = vector.multi_reduction <minsi>, %186, %cst_109 [1] : vector<16x16xi32> to vector<16xi32>
    %188 = vector.shape_cast %187 : vector<16xi32> to vector<16x1xi32>
    %189 = vector.shape_cast %182 : vector<16x1xf32> to vector<1x16x1xf32>
    %cst_110 = arith.constant dense<0xFF800000> : vector<1xf32>
    %190 = vector.multi_reduction <maximumf>, %189, %cst_110 [1, 2] : vector<1x16x1xf32> to vector<1xf32>
    %191 = vector.shape_cast %190 : vector<1xf32> to vector<1x1x1xf32>
    %192 = vector.extract %191[0, 0, 0] : f32 from vector<1x1x1xf32>
    %193 = vector.broadcast %192 : f32 to vector<16x1xf32>
    %194 = arith.cmpf oeq, %182, %193 : vector<16x1xf32>
    %c16_i32_111 = arith.constant 16 : i32
    %195 = vector.broadcast %c16_i32_111 : i32 to vector<16x1xi32>
    %196 = arith.select %194, %2, %195 : vector<16x1xi1>, vector<16x1xi32>
    %197 = vector.shape_cast %196 : vector<16x1xi32> to vector<1x16x1xi32>
    %cst_112 = arith.constant dense<2147483647> : vector<1xi32>
    %198 = vector.multi_reduction <minsi>, %197, %cst_112 [1, 2] : vector<1x16x1xi32> to vector<1xi32>
    %199 = vector.shape_cast %198 : vector<1xi32> to vector<1x1x1xi32>
    %200 = vector.extract %199[0, 0, 0] : i32 from vector<1x1x1xi32>
    %201 = vector.broadcast %200 : i32 to vector<16x1xi32>
    %202 = arith.cmpi eq, %2, %201 : vector<16x1xi32>
    %c16_i32_113 = arith.constant 16 : i32
    %203 = vector.broadcast %c16_i32_113 : i32 to vector<16x1xi32>
    %204 = arith.select %202, %188, %203 : vector<16x1xi1>, vector<16x1xi32>
    %205 = vector.shape_cast %204 : vector<16x1xi32> to vector<1x16x1xi32>
    %cst_114 = arith.constant dense<2147483647> : vector<1xi32>
    %206 = vector.multi_reduction <minsi>, %205, %cst_114 [1, 2] : vector<1x16x1xi32> to vector<1xi32>
    %207 = vector.shape_cast %206 : vector<1xi32> to vector<1x1x1xi32>
    %208 = vector.extract %207[0, 0, 0] : i32 from vector<1x1x1xi32>
    %c4_i32_115 = arith.constant 4 : i32
    %209 = arith.subi %208, %c4_i32_115 : i32
    %c0_i32_116 = arith.constant 0 : i32
    %210 = arith.maxsi %c0_i32_116, %209 : i32
    %c4_i32_117 = arith.constant 4 : i32
    %211 = arith.subi %200, %c4_i32_117 : i32
    %c0_i32_118 = arith.constant 0 : i32
    %212 = arith.maxsi %c0_i32_118, %211 : i32
    %c4_i32_119 = arith.constant 4 : i32
    %213 = arith.addi %208, %c4_i32_119 : i32
    %c16_i32_120 = arith.constant 16 : i32
    %214 = arith.minsi %c16_i32_120, %213 : i32
    %c4_i32_121 = arith.constant 4 : i32
    %215 = arith.addi %200, %c4_i32_121 : i32
    %c16_i32_122 = arith.constant 16 : i32
    %216 = arith.minsi %c16_i32_122, %215 : i32
    %217 = arith.subi %214, %210 : i32
    %c8_i32_123 = arith.constant 8 : i32
    %218 = arith.cmpi slt, %217, %c8_i32_123 : i32
    %c0_i32_124 = arith.constant 0 : i32
    %219 = arith.cmpi eq, %210, %c0_i32_124 : i32
    %220 = arith.andi %218, %219 : i1
    %c8_i32_125 = arith.constant 8 : i32
    %221 = arith.addi %210, %c8_i32_125 : i32
    %c16_i32_126 = arith.constant 16 : i32
    %222 = arith.minsi %c16_i32_126, %221 : i32
    %223 = arith.select %220, %222, %214 : i32
    %c0_i32_127 = arith.constant 0 : i32
    %224 = arith.cmpi ne, %210, %c0_i32_127 : i32
    %225 = arith.andi %218, %224 : i1
    %c8_i32_128 = arith.constant 8 : i32
    %226 = arith.subi %214, %c8_i32_128 : i32
    %c0_i32_129 = arith.constant 0 : i32
    %227 = arith.maxsi %c0_i32_129, %226 : i32
    %228 = arith.select %225, %227, %210 : i32
    %229 = arith.subi %216, %212 : i32
    %c8_i32_130 = arith.constant 8 : i32
    %230 = arith.cmpi slt, %229, %c8_i32_130 : i32
    %c0_i32_131 = arith.constant 0 : i32
    %231 = arith.cmpi eq, %212, %c0_i32_131 : i32
    %232 = arith.andi %230, %231 : i1
    %c8_i32_132 = arith.constant 8 : i32
    %233 = arith.addi %212, %c8_i32_132 : i32
    %c16_i32_133 = arith.constant 16 : i32
    %234 = arith.minsi %c16_i32_133, %233 : i32
    %235 = arith.select %232, %234, %216 : i32
    %c0_i32_134 = arith.constant 0 : i32
    %236 = arith.cmpi ne, %212, %c0_i32_134 : i32
    %237 = arith.andi %230, %236 : i1
    %c8_i32_135 = arith.constant 8 : i32
    %238 = arith.subi %216, %c8_i32_135 : i32
    %c0_i32_136 = arith.constant 0 : i32
    %239 = arith.maxsi %c0_i32_136, %238 : i32
    %240 = arith.select %237, %239, %212 : i32
    %c0_137 = arith.constant 0 : index
    %c2_138 = arith.constant 2 : index
    %c0_139 = arith.constant 0 : index
    %241 = memref.load %arg2[%c0_137, %c2_138, %c0_139] : memref<1x3x4xi32, #tpu.memory_space<smem>>
    memref.store %228, %arg2[%c0_137, %c2_138, %c0_139] : memref<1x3x4xi32, #tpu.memory_space<smem>>
    %c0_140 = arith.constant 0 : index
    %c2_141 = arith.constant 2 : index
    %c1_142 = arith.constant 1 : index
    %242 = memref.load %arg2[%c0_140, %c2_141, %c1_142] : memref<1x3x4xi32, #tpu.memory_space<smem>>
    memref.store %240, %arg2[%c0_140, %c2_141, %c1_142] : memref<1x3x4xi32, #tpu.memory_space<smem>>
    %c0_143 = arith.constant 0 : index
    %c2_144 = arith.constant 2 : index
    %c2_145 = arith.constant 2 : index
    %243 = memref.load %arg2[%c0_143, %c2_144, %c2_145] : memref<1x3x4xi32, #tpu.memory_space<smem>>
    memref.store %223, %arg2[%c0_143, %c2_144, %c2_145] : memref<1x3x4xi32, #tpu.memory_space<smem>>
    %c0_146 = arith.constant 0 : index
    %c2_147 = arith.constant 2 : index
    %c3_148 = arith.constant 3 : index
    %244 = memref.load %arg2[%c0_146, %c2_147, %c3_148] : memref<1x3x4xi32, #tpu.memory_space<smem>>
    memref.store %235, %arg2[%c0_146, %c2_147, %c3_148] : memref<1x3x4xi32, #tpu.memory_space<smem>>
    %c2_i32_149 = arith.constant 2 : i32
    %245 = arith.subi %228, %c2_i32_149 : i32
    %c0_i32_150 = arith.constant 0 : i32
    %246 = arith.maxsi %c0_i32_150, %245 : i32
    %c2_i32_151 = arith.constant 2 : i32
    %247 = arith.subi %240, %c2_i32_151 : i32
    %c0_i32_152 = arith.constant 0 : i32
    %248 = arith.maxsi %c0_i32_152, %247 : i32
    %c2_i32_153 = arith.constant 2 : i32
    %249 = arith.addi %223, %c2_i32_153 : i32
    %c16_i32_154 = arith.constant 16 : i32
    %250 = arith.minsi %c16_i32_154, %249 : i32
    %c2_i32_155 = arith.constant 2 : i32
    %251 = arith.addi %235, %c2_i32_155 : i32
    %c16_i32_156 = arith.constant 16 : i32
    %252 = arith.minsi %c16_i32_156, %251 : i32
    %253 = vector.broadcast %248 : i32 to vector<16x16xi32>
    %254 = arith.cmpi sge, %0, %253 : vector<16x16xi32>
    %255 = vector.broadcast %252 : i32 to vector<16x16xi32>
    %256 = arith.cmpi slt, %0, %255 : vector<16x16xi32>
    %257 = arith.andi %254, %256 : vector<16x16xi1>
    %258 = vector.broadcast %246 : i32 to vector<16x16xi32>
    %259 = arith.cmpi sge, %1, %258 : vector<16x16xi32>
    %260 = arith.andi %257, %259 : vector<16x16xi1>
    %261 = vector.broadcast %250 : i32 to vector<16x16xi32>
    %262 = arith.cmpi slt, %1, %261 : vector<16x16xi32>
    %263 = arith.andi %260, %262 : vector<16x16xi1>
    %cst_157 = arith.constant 0xFF800000 : f32
    %264 = vector.broadcast %cst_157 : f32 to vector<16x16xf32>
    %265 = arith.select %263, %264, %180 : vector<16x16xi1>, vector<16x16xf32>
    %c0_158 = arith.constant 0 : index
    %c0_159 = arith.constant 0 : index
    %266 = vector.load %arg3[%c0_158, %c0_159] : memref<16x16xf32, #tpu.memory_space<vmem>>, vector<16x16xf32>
    tpu.vector_store %arg3[%c0_158, %c0_159], %265 {strides = array<i32>} : memref<16x16xf32, #tpu.memory_space<vmem>>, vector<16x16xf32>,
    return
  }
  func.func @transform_0(%arg0: i32) -> (i32, i32, i32) {
    %c0_i32 = arith.constant 0 : i32
    %c0_i32_0 = arith.constant 0 : i32
    %c0_i32_1 = arith.constant 0 : i32
    return %arg0, %c0_i32, %c0_i32_0 : i32, i32, i32
  }
  func.func @transform_1(%arg0: i32) -> (i32, i32, i32) {
    %c0_i32 = arith.constant 0 : i32
    %c0_i32_0 = arith.constant 0 : i32
    %c0_i32_1 = arith.constant 0 : i32
    return %arg0, %c0_i32, %c0_i32_0 : i32, i32, i32
  }
}

module attributes {stable_mosaic.version = 11 : i64} {
  func.func @_resize_kernel(%arg0: i32, %arg1: memref<2x3x4xi32, #tpu.memory_space<smem>>, %arg2: memref<12x8xf32, #tpu.memory_space<vmem>>, %arg3: memref<1x4x16x16xf32, #tpu.memory_space<vmem>>, %arg4: memref<1x3x12x48xf32, #tpu.memory_space<vmem>>) attributes {dimension_semantics = [#tpu.dimension_semantics<parallel>], iteration_bounds = array<i64: 2>, scalar_prefetch = 1 : i64, scratch_operands = 0 : i64, tpu.core_type = #tpu.core_type<tc>, window_params = [{pipeline_mode = #tpu.pipeline_mode<synchronous>, transform_indices = @transform_0, window_bounds = array<i64: 12, 8>}, {transform_indices = @transform_1, window_bounds = array<i64: 1, 4, 16, 16>}, {transform_indices = @transform_2, window_bounds = array<i64: 1, 3, 12, 48>}]} {
    %c0 = arith.constant 0 : index
    %c0_0 = arith.constant 0 : index
    %0 = vector.load %arg2[%c0, %c0_0] : memref<12x8xf32, #tpu.memory_space<vmem>>, vector<12x8xf32>
    %1 = tpu.iota {dimensions = array<i32: 1>} : vector<1x12xi32>
    %2 = arith.sitofp %1 : vector<1x12xi32> to vector<1x12xf32>
    %cst = arith.constant 5.000000e-01 : f32
    %3 = vector.broadcast %cst : f32 to vector<1x12xf32>
    %4 = arith.addf %2, %3 : vector<1x12xf32>
    %cst_1 = arith.constant 0.666666686 : f32
    %5 = vector.broadcast %cst_1 : f32 to vector<1x12xf32>
    %6 = arith.mulf %4, %5 : vector<1x12xf32>
    %cst_2 = arith.constant 5.000000e-01 : f32
    %7 = vector.broadcast %cst_2 : f32 to vector<1x12xf32>
    %8 = arith.subf %6, %7 : vector<1x12xf32>
    %cst_3 = arith.constant 0.000000e+00 : f32
    %cst_4 = arith.constant 7.000000e+00 : f32
    %9 = vector.broadcast %cst_3 : f32 to vector<1x12xf32>
    %10 = arith.maximumf %9, %8 : vector<1x12xf32>
    %11 = vector.broadcast %cst_4 : f32 to vector<1x12xf32>
    %12 = arith.minimumf %11, %10 : vector<1x12xf32>
    %13 = tpu.iota {dimensions = array<i32: 0>} : vector<16x1xi32>
    %14 = arith.sitofp %13 : vector<16x1xi32> to vector<16x1xf32>
    %15 = arith.index_cast %arg0 : i32 to index
    %c0_5 = arith.constant 0 : index
    %c0_6 = arith.constant 0 : index
    %16 = memref.load %arg1[%15, %c0_5, %c0_6] : memref<2x3x4xi32, #tpu.memory_space<smem>>
    %17 = arith.index_cast %arg0 : i32 to index
    %c0_7 = arith.constant 0 : index
    %c1 = arith.constant 1 : index
    %18 = memref.load %arg1[%17, %c0_7, %c1] : memref<2x3x4xi32, #tpu.memory_space<smem>>
    %19 = arith.sitofp %16 : i32 to f32
    %20 = vector.broadcast %19 : f32 to vector<1x12xf32>
    %21 = arith.addf %12, %20 : vector<1x12xf32>
    %22 = vector.broadcast %21 : vector<1x12xf32> to vector<16x12xf32>
    %23 = vector.broadcast %14 : vector<16x1xf32> to vector<16x12xf32>
    %24 = arith.subf %22, %23 : vector<16x12xf32>
    %25 = math.absf %24 : vector<16x12xf32>
    %cst_8 = arith.constant 1.000000e+00 : f32
    %26 = vector.broadcast %cst_8 : f32 to vector<16x12xf32>
    %27 = arith.subf %26, %25 : vector<16x12xf32>
    %cst_9 = arith.constant 0.000000e+00 : f32
    %28 = vector.broadcast %cst_9 : f32 to vector<16x12xf32>
    %29 = arith.maximumf %28, %27 : vector<16x12xf32>
    %c0_10 = arith.constant 0 : index
    %c0_11 = arith.constant 0 : index
    %30 = arith.index_cast %18 : i32 to index
    %c0_12 = arith.constant 0 : index
    %31 = vector.load %arg3[%c0_10, %c0_11, %30, %c0_12] : memref<1x4x16x16xf32, #tpu.memory_space<vmem>>, vector<1x4x8x16xf32>
    %32 = vector.shape_cast %31 : vector<1x4x8x16xf32> to vector<4x8x16xf32>
    %33 = vector.shape_cast %32 : vector<4x8x16xf32> to vector<32x16xf32>
    %cst_13 = arith.constant dense<0.000000e+00> : vector<32x12xf32>
    %34 = tpu.matmul %33, %29, %cst_13 {dimension_numbers = #tpu.dot_dimension_numbers<[1], [0], [0], [1], [0, 0, 1, 1], [], []>, precision = #tpu.contract_precision<fp32>} : vector<32x16xf32>, vector<16x12xf32>, vector<32x12xf32> -> vector<32x12xf32>
    %35 = vector.extract_strided_slice %34 {offsets = [0, 0], sizes = [8, 12], strides = [1, 1]} : vector<32x12xf32> to vector<8x12xf32>
    %36 = vector.extract_strided_slice %34 {offsets = [8, 0], sizes = [8, 12], strides = [1, 1]} : vector<32x12xf32> to vector<8x12xf32>
    %37 = vector.extract_strided_slice %34 {offsets = [16, 0], sizes = [8, 12], strides = [1, 1]} : vector<32x12xf32> to vector<8x12xf32>
    %38 = vector.extract_strided_slice %34 {offsets = [24, 0], sizes = [8, 12], strides = [1, 1]} : vector<32x12xf32> to vector<8x12xf32>
    %39 = tpu.concatenate %35, %36, %37, %38 in 1 : vector<8x12xf32>, vector<8x12xf32>, vector<8x12xf32>, vector<8x12xf32> -> vector<8x48xf32>
    %cst_14 = arith.constant dense<0.000000e+00> : vector<12x48xf32>
    %40 = tpu.matmul %0, %39, %cst_14 {dimension_numbers = #tpu.dot_dimension_numbers<[1], [0], [0], [1], [0, 0, 1, 1], [], []>, precision = #tpu.contract_precision<fp32>} : vector<12x8xf32>, vector<8x48xf32>, vector<12x48xf32> -> vector<12x48xf32>
    %c0_15 = arith.constant 0 : index
    %c0_16 = arith.constant 0 : index
    %c0_17 = arith.constant 0 : index
    %c0_18 = arith.constant 0 : index
    %41 = vector.load %arg4[%c0_15, %c0_16, %c0_17, %c0_18] : memref<1x3x12x48xf32, #tpu.memory_space<vmem>>, vector<1x1x12x48xf32>
    %42 = vector.shape_cast %41 : vector<1x1x12x48xf32> to vector<12x48xf32>
    %43 = vector.shape_cast %40 : vector<12x48xf32> to vector<1x1x12x48xf32>
    tpu.vector_store %arg4[%c0_15, %c0_16, %c0_17, %c0_18], %43 {strides = array<i32>} : memref<1x3x12x48xf32, #tpu.memory_space<vmem>>, vector<1x1x12x48xf32>,
    %44 = arith.index_cast %arg0 : i32 to index
    %c1_19 = arith.constant 1 : index
    %c0_20 = arith.constant 0 : index
    %45 = memref.load %arg1[%44, %c1_19, %c0_20] : memref<2x3x4xi32, #tpu.memory_space<smem>>
    %46 = arith.index_cast %arg0 : i32 to index
    %c1_21 = arith.constant 1 : index
    %c1_22 = arith.constant 1 : index
    %47 = memref.load %arg1[%46, %c1_21, %c1_22] : memref<2x3x4xi32, #tpu.memory_space<smem>>
    %48 = arith.sitofp %45 : i32 to f32
    %49 = vector.broadcast %48 : f32 to vector<1x12xf32>
    %50 = arith.addf %12, %49 : vector<1x12xf32>
    %51 = vector.broadcast %50 : vector<1x12xf32> to vector<16x12xf32>
    %52 = vector.broadcast %14 : vector<16x1xf32> to vector<16x12xf32>
    %53 = arith.subf %51, %52 : vector<16x12xf32>
    %54 = math.absf %53 : vector<16x12xf32>
    %cst_23 = arith.constant 1.000000e+00 : f32
    %55 = vector.broadcast %cst_23 : f32 to vector<16x12xf32>
    %56 = arith.subf %55, %54 : vector<16x12xf32>
    %cst_24 = arith.constant 0.000000e+00 : f32
    %57 = vector.broadcast %cst_24 : f32 to vector<16x12xf32>
    %58 = arith.maximumf %57, %56 : vector<16x12xf32>
    %c0_25 = arith.constant 0 : index
    %c0_26 = arith.constant 0 : index
    %59 = arith.index_cast %47 : i32 to index
    %c0_27 = arith.constant 0 : index
    %60 = vector.load %arg3[%c0_25, %c0_26, %59, %c0_27] : memref<1x4x16x16xf32, #tpu.memory_space<vmem>>, vector<1x4x8x16xf32>
    %61 = vector.shape_cast %60 : vector<1x4x8x16xf32> to vector<4x8x16xf32>
    %62 = vector.shape_cast %61 : vector<4x8x16xf32> to vector<32x16xf32>
    %cst_28 = arith.constant dense<0.000000e+00> : vector<32x12xf32>
    %63 = tpu.matmul %62, %58, %cst_28 {dimension_numbers = #tpu.dot_dimension_numbers<[1], [0], [0], [1], [0, 0, 1, 1], [], []>, precision = #tpu.contract_precision<fp32>} : vector<32x16xf32>, vector<16x12xf32>, vector<32x12xf32> -> vector<32x12xf32>
    %64 = vector.extract_strided_slice %63 {offsets = [0, 0], sizes = [8, 12], strides = [1, 1]} : vector<32x12xf32> to vector<8x12xf32>
    %65 = vector.extract_strided_slice %63 {offsets = [8, 0], sizes = [8, 12], strides = [1, 1]} : vector<32x12xf32> to vector<8x12xf32>
    %66 = vector.extract_strided_slice %63 {offsets = [16, 0], sizes = [8, 12], strides = [1, 1]} : vector<32x12xf32> to vector<8x12xf32>
    %67 = vector.extract_strided_slice %63 {offsets = [24, 0], sizes = [8, 12], strides = [1, 1]} : vector<32x12xf32> to vector<8x12xf32>
    %68 = tpu.concatenate %64, %65, %66, %67 in 1 : vector<8x12xf32>, vector<8x12xf32>, vector<8x12xf32>, vector<8x12xf32> -> vector<8x48xf32>
    %cst_29 = arith.constant dense<0.000000e+00> : vector<12x48xf32>
    %69 = tpu.matmul %0, %68, %cst_29 {dimension_numbers = #tpu.dot_dimension_numbers<[1], [0], [0], [1], [0, 0, 1, 1], [], []>, precision = #tpu.contract_precision<fp32>} : vector<12x8xf32>, vector<8x48xf32>, vector<12x48xf32> -> vector<12x48xf32>
    %c0_30 = arith.constant 0 : index
    %c1_31 = arith.constant 1 : index
    %c0_32 = arith.constant 0 : index
    %c0_33 = arith.constant 0 : index
    %70 = vector.load %arg4[%c0_30, %c1_31, %c0_32, %c0_33] : memref<1x3x12x48xf32, #tpu.memory_space<vmem>>, vector<1x1x12x48xf32>
    %71 = vector.shape_cast %70 : vector<1x1x12x48xf32> to vector<12x48xf32>
    %72 = vector.shape_cast %69 : vector<12x48xf32> to vector<1x1x12x48xf32>
    tpu.vector_store %arg4[%c0_30, %c1_31, %c0_32, %c0_33], %72 {strides = array<i32>} : memref<1x3x12x48xf32, #tpu.memory_space<vmem>>, vector<1x1x12x48xf32>,
    %73 = arith.index_cast %arg0 : i32 to index
    %c2 = arith.constant 2 : index
    %c0_34 = arith.constant 0 : index
    %74 = memref.load %arg1[%73, %c2, %c0_34] : memref<2x3x4xi32, #tpu.memory_space<smem>>
    %75 = arith.index_cast %arg0 : i32 to index
    %c2_35 = arith.constant 2 : index
    %c1_36 = arith.constant 1 : index
    %76 = memref.load %arg1[%75, %c2_35, %c1_36] : memref<2x3x4xi32, #tpu.memory_space<smem>>
    %77 = arith.sitofp %74 : i32 to f32
    %78 = vector.broadcast %77 : f32 to vector<1x12xf32>
    %79 = arith.addf %12, %78 : vector<1x12xf32>
    %80 = vector.broadcast %79 : vector<1x12xf32> to vector<16x12xf32>
    %81 = vector.broadcast %14 : vector<16x1xf32> to vector<16x12xf32>
    %82 = arith.subf %80, %81 : vector<16x12xf32>
    %83 = math.absf %82 : vector<16x12xf32>
    %cst_37 = arith.constant 1.000000e+00 : f32
    %84 = vector.broadcast %cst_37 : f32 to vector<16x12xf32>
    %85 = arith.subf %84, %83 : vector<16x12xf32>
    %cst_38 = arith.constant 0.000000e+00 : f32
    %86 = vector.broadcast %cst_38 : f32 to vector<16x12xf32>
    %87 = arith.maximumf %86, %85 : vector<16x12xf32>
    %c0_39 = arith.constant 0 : index
    %c0_40 = arith.constant 0 : index
    %88 = arith.index_cast %76 : i32 to index
    %c0_41 = arith.constant 0 : index
    %89 = vector.load %arg3[%c0_39, %c0_40, %88, %c0_41] : memref<1x4x16x16xf32, #tpu.memory_space<vmem>>, vector<1x4x8x16xf32>
    %90 = vector.shape_cast %89 : vector<1x4x8x16xf32> to vector<4x8x16xf32>
    %91 = vector.shape_cast %90 : vector<4x8x16xf32> to vector<32x16xf32>
    %cst_42 = arith.constant dense<0.000000e+00> : vector<32x12xf32>
    %92 = tpu.matmul %91, %87, %cst_42 {dimension_numbers = #tpu.dot_dimension_numbers<[1], [0], [0], [1], [0, 0, 1, 1], [], []>, precision = #tpu.contract_precision<fp32>} : vector<32x16xf32>, vector<16x12xf32>, vector<32x12xf32> -> vector<32x12xf32>
    %93 = vector.extract_strided_slice %92 {offsets = [0, 0], sizes = [8, 12], strides = [1, 1]} : vector<32x12xf32> to vector<8x12xf32>
    %94 = vector.extract_strided_slice %92 {offsets = [8, 0], sizes = [8, 12], strides = [1, 1]} : vector<32x12xf32> to vector<8x12xf32>
    %95 = vector.extract_strided_slice %92 {offsets = [16, 0], sizes = [8, 12], strides = [1, 1]} : vector<32x12xf32> to vector<8x12xf32>
    %96 = vector.extract_strided_slice %92 {offsets = [24, 0], sizes = [8, 12], strides = [1, 1]} : vector<32x12xf32> to vector<8x12xf32>
    %97 = tpu.concatenate %93, %94, %95, %96 in 1 : vector<8x12xf32>, vector<8x12xf32>, vector<8x12xf32>, vector<8x12xf32> -> vector<8x48xf32>
    %cst_43 = arith.constant dense<0.000000e+00> : vector<12x48xf32>
    %98 = tpu.matmul %0, %97, %cst_43 {dimension_numbers = #tpu.dot_dimension_numbers<[1], [0], [0], [1], [0, 0, 1, 1], [], []>, precision = #tpu.contract_precision<fp32>} : vector<12x8xf32>, vector<8x48xf32>, vector<12x48xf32> -> vector<12x48xf32>
    %c0_44 = arith.constant 0 : index
    %c2_45 = arith.constant 2 : index
    %c0_46 = arith.constant 0 : index
    %c0_47 = arith.constant 0 : index
    %99 = vector.load %arg4[%c0_44, %c2_45, %c0_46, %c0_47] : memref<1x3x12x48xf32, #tpu.memory_space<vmem>>, vector<1x1x12x48xf32>
    %100 = vector.shape_cast %99 : vector<1x1x12x48xf32> to vector<12x48xf32>
    %101 = vector.shape_cast %98 : vector<12x48xf32> to vector<1x1x12x48xf32>
    tpu.vector_store %arg4[%c0_44, %c2_45, %c0_46, %c0_47], %101 {strides = array<i32>} : memref<1x3x12x48xf32, #tpu.memory_space<vmem>>, vector<1x1x12x48xf32>,
    return
  }
  func.func @transform_0(%arg0: i32, %arg1: memref<2x3x4xi32, #tpu.memory_space<smem>>) -> (i32, i32) {
    %c0_i32 = arith.constant 0 : i32
    %c0_i32_0 = arith.constant 0 : i32
    %c0_i32_1 = arith.constant 0 : i32
    return %c0_i32, %c0_i32_0 : i32, i32
  }
  func.func @transform_1(%arg0: i32, %arg1: memref<2x3x4xi32, #tpu.memory_space<smem>>) -> (i32, i32, i32, i32) {
    %c0_i32 = arith.constant 0 : i32
    %c0_i32_0 = arith.constant 0 : i32
    %c0_i32_1 = arith.constant 0 : i32
    %c0_i32_2 = arith.constant 0 : i32
    return %arg0, %c0_i32, %c0_i32_0, %c0_i32_1 : i32, i32, i32, i32
  }
  func.func @transform_2(%arg0: i32, %arg1: memref<2x3x4xi32, #tpu.memory_space<smem>>) -> (i32, i32, i32, i32) {
    %c0_i32 = arith.constant 0 : i32
    %c0_i32_0 = arith.constant 0 : i32
    %c0_i32_1 = arith.constant 0 : i32
    %c0_i32_2 = arith.constant 0 : i32
    return %arg0, %c0_i32, %c0_i32_0, %c0_i32_1 : i32, i32, i32, i32
  }
}

</mosaic_0001>

<bundles_post_ra>
// kernel: _forward.2
= control target key start
LH: loop header
LB: loop body
LE: loop exit
PB: predicated region body
PF: predicated region fallthrough
CT: control target
= control target key end

     0   :  { %6 = vsyncpa [#allocation4], 0  ;;  %s1355_s0 = inlined_call_operand.hbm [shape: f32[2,16,16], index: 0, kind: input, shape index: {}]   ;;  %s1356_s1 = inlined_call_operand.vmem [shape: s32[2,3,4], index: 1, kind: output, shape index: {}]  }
   0x1   :  { %8 = vsyncpa [#allocation4 + $0x1], 0 }
   0x2   :  { %9 = vsyncpa [#allocation5], 0 }
   0x3   :  { %11 = vsyncpa [#allocation5 + $0x1], 0  ;;  %s936_s6 = smov 0   ;;  %s938_s7 = smov 0  }
   0x4   :  { %s940_s8 = smov 0   ;;  %s942_s9 = smov 0  }
   0x5 LB: > { %s957_s10 = sadd.s32 4294967295, %s921_s9   ;;  %s734_s11 = sadd.s32 4294967294, %s921_s9   ;;  %s921_s9 = sphi %s942_s9, %s1396_s9   ;;  %s917_s8 = sphi %s940_s8, %s1395_s8   ;;  %s913_s7 = sphi %s938_s7, %s1394_s7   ;;  %s909_s6 = sphi %s936_s6, %s1393_s6  }
   0x6   : > { %s961_s12 = sadd.s32 1, %s921_s9   ;;  %s24_s13 = sadd.s32 1, %s917_s8 }
   0x7   : > { %s21_s14 = ssub.s32 %s921_s9, %s961_s12  ;;  %p31_p0 = scmp.ne.s32.totalorder %s917_s8, %s913_s7 }
   0x8   : > { %p22_p1 = scmp.eq.s32.totalorder %s21_s14, 0  ;;  %p32_p2 = scmp.eq.s32.totalorder %s921_s9, 0 }
   0x9   : > { %p37_p3 = scmp.ne.s32.totalorder %s913_s7, %s909_s6  ;;  %p38_p4 = scmp.eq.s32.totalorder %s957_s10, 0 }
   0xa   : > { %s973_s15 = scalar_select %p22_p1, %s917_s8, %s24_s13  }
   0xb   : > { %p975_p5 = por %p32_p2, %p31_p0  ;;  %p979_p6 = por %p38_p4, %p37_p3 }
   0xc   : > { %p61_p7 = scmp.eq.s32.totalorder %s957_s10, 1  ;;  %p67_p8 = scmp.eq.s32.totalorder %s734_s11, 1 }
   0xd   : > { %p1357_p9 = scmp.lt.s32.totalorder %s921_s9, 2  ;;  %s87_s20 = sand.u32 1, %s917_s8  }
   0xe   : > { %p985_p10 = por %p61_p7, %p31_p0  ;;  %p989_p11 = por %p67_p8, %p37_p3 }
   0xf   : > { %s777_s21 = sshll.u32 %s921_s9, 8  ;;  %s737_s22 = sshll.u32 %s87_s20, 4 }
  0x10   : > { %s1362_s18 = scalar_select %p985_p10, 1, 0 }
  0x11   : > { %s1363_s19 = scalar_select %p989_p11, 1, 0 }
  0x12   : > { %s998_s25 = scalar_lea.hbm %s1355_s0, %s777_s21  ;;  %s91_s26 = scalar_lea.vmem [#allocation3], %s737_s22 }
  0x13   : > { %s98_s27 = sshll.u32 %s91_s26, 4  ;;  %p1004_p12 = pnand %p1357_p9, %p975_p5  ;;  %s1008_s27 = int_to_ptr.vmem [resolvable:$true] %s98_s27 }
  0x14   : > { %s1010_s29 = scalar_lea.sflag [#allocation4], %s87_s20  ;;  %s839_s30 = scalar_lea.hbm %s998_s25, 256 }
  0x15   : > { %p840_p13 = scmp.ne.s32.totalorder %s998_s25, %s839_s30  ;;  %p841_p0 = pneg %p1004_p12 }
  0x16   : > { %s844_s4 = scalar_lea.hbm %s1355_s0, 512  ;;  %p845_p3 = scmp.lt.u32.totalorder %s998_s25, %s1355_s0 }
  0x17   : > { %p842_p1 = pnand %p841_p0, %p840_p13  ;;  %p846_p4 = scmp.lt.u32.totalorder %s844_s4, %s839_s30 }
  0x18   : > { %p848_p7 = scmp.lt.u32.totalorder %s839_s30, %s998_s25 }
  0x19   : > { %p843_p2 = pneg %p842_p1  ;;  %p847_p5 = por %p846_p4, %p845_p3 }
  0x1b   : > { %p849_p8 = por %p848_p7, %p847_p5 }
  0x1d   : > { %p850_p9 = pnand %p849_p8, %p843_p2 }
  0x1f   : > { %853 = shalt.err (!%p850_p9)
}
  0x20   : > { %s854_s13 = scalar_lea.vmem %s1008_s27, 256  ;;  %s923_s14 = smov [#allocation3]  }
  0x21   : > { %p855_p13 = scmp.ne.s32.totalorder %s1008_s27, %s854_s13  ;;  %s859_s16 = sshll.u32 %s923_s14, 4  ;;  %s860_s16 = int_to_ptr.vmem [resolvable:$false] %s859_s16 }
  0x22   : > { %s861_s20 = scalar_lea.vmem %s860_s16, 512  ;;  %p862_p10 = scmp.lt.s32.totalorder %s1008_s27, %s860_s16 }
  0x23   : > { %p857_p1 = pnand %p855_p13, %p841_p0  ;;  %p863_p3 = scmp.lt.s32.totalorder %s861_s20, %s854_s13 }
  0x25   : > { %p858_p11 = pneg %p857_p1  ;;  %p864_p4 = por %p863_p3, %p862_p10 }
  0x27   : > { %p865_p5 = pnand %p864_p4, %p858_p11 }
  0x29   : > { %868 = shalt.err (!%p865_p5)
}
  0x2a   : > { %s924_s21 = smov 128   ;;  %s925_s22 = smov 8  }
  0x2b   : > { %803 = dma.hbm_to_vmem [thread:$0]  (!%p1004_p12), %s998_s25, 256, %s1008_s27, %s1010_s29, %s924_s21, %s924_s21, %s925_s22  }
  0x2c   : > { %p740_p9 = scmp.ge.s32.totalorder %s921_s9, 1  ;;  %p106_p0 = scmp.lt.s32.totalorder %s921_s9, 3 }
  0x2e   : > { %p107_p2 = pnand %p740_p9, %p106_p0 }
  0x2f   : > { %s1041_s23 = sand.u32 (!%p107_p2), 1, %s913_s7  }
  0x30   : > { %110 = sbr.rel (%p107_p2) target bundleno = 1684 (0x694), region = 24  ;;  %s741_s24 = sshll.u32 (!%p107_p2), %s1041_s23, 4 }
  0x31   : > { %s113_s26 = scalar_lea.sflag (!%p107_p2), [#allocation4], %s1041_s23  ;;  %s116_s30 = scalar_lea.vmem (!%p107_p2), [#allocation3], %s741_s24 }
  0x37   : > { %900 = dma.done.wait (%p979_p6), %s113_s26, 256  }
  0x38   : > { %902 = vsyncadd (%p979_p6), %s113_s26, 4294967040  ;;  %vm142_vm0 = vcmask 130048   ;;  %v140_v0 = vld [vmem:[%s116_s30] sm:$0xff]  ;;  %v141_v1 = vld [vmem:[%s116_s30 + $0x8] sm:$0xff]  ;;  %v135_v6 = vlaneseq  ;;  %s742_s25 = sshll.u32 %s1041_s23, 9 }
  0x39   : > { %143 = vst.msk [vmem:[#allocation2] sm:$0xff] %vm142_vm0, %v140_v0  ;;  %144 = vst.msk [vmem:[#allocation2 + $0x8] sm:$0xff] %vm142_vm0, %v141_v1  ;;  %s1092_s5 = scalar_lea.smem [#allocation6], %s742_s25 }
  0x3a   : > { %v1059_v7 = vand.u32 127, %v135_v6  ;;  %v1079_v25 = vshrl.u32 %v135_v6, 7  ;;  %s279_s11 = scalar_lea.smem %s1092_s5, 3 [#allocation6]  ;;  %s275_s14 = scalar_lea.smem %s1092_s5, 1 [#allocation6] }
  0x3c   : > { %v1082_v26 = vadd.s32 8, %v1079_v25 }
  0x40   : > { %v1051_v2 = vld [vmem:[#allocation2] sm:$0xff]  ;;  %v1053_v3 = vld [vmem:[#allocation2 + $0x8] sm:$0xff] }
  0x41   : > { %v147_v4 = vsel %vm142_vm0, %v1051_v2, -inf  ;;  %v150_v5 = vsel %vm142_vm0, %v1053_v3, -inf }
  0x42   : > { %148 = vmax.xlane.f32.xlu0 %v147_v4 }
  0x46   : > { %151 = vmax.xlane.f32.xlu0 %v150_v5 }
  0xcf   : > { %v149_v8 = vpop.xlane.xlu0 %148 }
  0xd0   : > { %vm153_vm1 = vcmp.eq.f32.partialorder %v1051_v2, %v149_v8 }
  0xd1   : > { %v155_v9 = vsel %vm153_vm1, %v1059_v7, 16 }
  0xd2   : > { %v1064_v10 = vsel %vm142_vm0, %v155_v9, 2147483647 }
  0xd3   : > { %v152_v11 = vpop.xlane.xlu0 %151  ;;  %v159_v12 = vshra.s32 %v1064_v10, 16  ;;  %v158_v37 = vand.u32 65535, %v1064_v10 }
  0xd4   : > { %vm154_vm2 = vcmp.eq.f32.partialorder %v1053_v3, %v152_v11  ;;  %v187_v13 = vmax.f32 %v149_v8, %v152_v11 }
  0xd5   : > { %v1068_v14 = vcvt.s32.f32 %v159_v12  ;;  %v156_v15 = vsel %vm154_vm2, %v1059_v7, 16  ;;  %v160_v39 = vcvt.s32.f32 %v158_v37 }
  0xd6   : > { %v188_v16 = vrot.slane %v187_v13, 4  ;;  %v1072_v17 = vsel %vm142_vm0, %v156_v15, 2147483647 }
  0xd7   : > { %162 = vmin.xlane.f32.xlu1 %v1068_v14  ;;  %v174_v18 = vshra.s32 %v1072_v17, 16  ;;  %v173_v40 = vand.u32 65535, %v1072_v17 }
  0xd8   : > { %v189_v19 = vmax.f32 %v187_v13, %v188_v16 }
  0xd9   : > { %v1076_v20 = vcvt.s32.f32 %v174_v18  ;;  %v175_v43 = vcvt.s32.f32 %v173_v40 }
  0xda   : > { %v190_v21 = vrot.slane %v189_v19, 2 }
  0xdb   : > { %177 = vmin.xlane.f32.xlu1 %v1076_v20 }
  0xdc   : > { %v191_v22 = vmax.f32 %v189_v19, %v190_v21 }
  0xde   : > { %v192_v23 = vrot.slane %v191_v22, 1 }
  0xe0   : > { %v193_v24 = vmax.f32 %v191_v22, %v192_v23 }
  0xe2   : > { %778 = vpush %v193_v24 }
 0x113   : > { %s779_s17 = spop %778 }
 0x114   : > { %v195_v27 = vstv %s779_s17  ;;  %s277_s17 = scalar_lea.smem %s1092_s5, 2 [#allocation6] }
 0x115   : > { %vm196_vm3 = vcmp.eq.f32.partialorder %v149_v8, %v195_v27  ;;  %vm197_vm4 = vcmp.eq.f32.partialorder %v152_v11, %v195_v27 }
 0x116   : > { %v198_v28 = vsel %vm196_vm3, %v1079_v25, 16  ;;  %v199_v29 = vsel %vm197_vm4, %v1082_v26, 16 }
 0x117   : > { %vm200_vm5 = vcmp.lt.s32.totalorder %v198_v28, %v199_v29 }
 0x118   : > { %v201_v30 = vsel %vm200_vm5, %v198_v28, %v199_v29 }
 0x119   : > { %v202_v31 = vrot.slane %v201_v30, 4 }
 0x11b   : > { %vm203_vm6 = vcmp.lt.s32.totalorder %v201_v30, %v202_v31 }
 0x11c   : > { %v204_v32 = vsel %vm203_vm6, %v201_v30, %v202_v31 }
 0x11d   : > { %v205_v33 = vrot.slane %v204_v32, 2 }
 0x11f   : > { %vm206_vm7 = vcmp.lt.s32.totalorder %v204_v32, %v205_v33 }
 0x120   : > { %v207_v34 = vsel %vm206_vm7, %v204_v32, %v205_v33 }
 0x121   : > { %v208_v35 = vrot.slane %v207_v34, 1 }
 0x123   : > { %vm209_vm8 = vcmp.lt.s32.totalorder %v207_v34, %v208_v35 }
 0x124   : > { %v210_v36 = vsel %vm209_vm8, %v207_v34, %v208_v35 }
 0x125   : > { %780 = vpush %v210_v36 }
 0x156   : > { %s1087_s27 = spop %780 }
 0x157   : > { %s744_s28 = sadd.s32 4294967292, %s1087_s27  ;;  %s238_s29 = sadd.s32 4, %s1087_s27  ;;  %v212_v57 = vstv %s1087_s27 }
 0x158   : > { %p233_p6 = scmp.gt.s32.totalorder %s744_s28, 0  ;;  %p239_p10 = scmp.lt.s32.totalorder %s238_s29, 16  ;;  %vm213_vm2 = vcmp.eq.s32.totalorder %v1079_v25, %v212_v57  ;;  %vm214_vm3 = vcmp.eq.s32.totalorder %v1082_v26, %v212_v57 }
 0x15a   : > { %s1398_s28 = smov (!%p233_p6, %s744_s28), 0  ;;  %s1400_s29 = smov (!%p239_p10, %s238_s29), 16 }
 0x15b   : > { %p259_p11 = scmp.eq.s32.totalorder %s1398_s28, 0  ;;  %s262_s2 = sadd.s32 8, %s1398_s28 }
 0x15c   : > { %s257_s3 = ssub.s32 %s1400_s29, %s1398_s28  ;;  %p263_p12 = scmp.lt.s32.totalorder %s262_s2, 16 }
 0x15d   : > { %p258_p7 = scmp.lt.s32.totalorder %s257_s3, 8  ;;  %p266_p8 = scmp.ne.s32.totalorder %s1398_s28, 0 }
 0x15e   : > { %s1402_s2 = smov (!%p263_p12, %s262_s2), 16  ;;  %s749_s4 = sadd.s32 4294967288, %s1400_s29 }
 0x15f   : > { %p260_p13 = pnand %p259_p11, %p258_p7  ;;  %p267_p1 = pnand %p266_p8, %p258_p7 }
 0x160   : > { %p270_p3 = scmp.gt.s32.totalorder %s749_s4, 0 }
 0x161   : > { %s1404_s29 = smov (!%p260_p13, %s1400_s29), %s1402_s2 }
 0x162   : > { %280 = sst [smem:[%s279_s11]] %s1404_s29  ;;  %s290_s13 = sadd.s32 2, %s1404_s29 }
 0x163   : > { %s1406_s4 = smov (!%p270_p3, %s749_s4), 0  ;;  %p291_p4 = scmp.lt.s32.totalorder %s290_s13, 16 }
 0x164   : > { %v163_v38 = vpop.xlane.xlu1 %162  ;;  %s1408_s28 = smov (!%p267_p1, %s1398_s28), %s1406_s4 }
 0x165   : > { %vm164_vm9 = vcmp.eq.f32.partialorder %v1068_v14, %v163_v38  ;;  %s1410_s13 = smov (!%p291_p4, %s290_s13), 16  ;;  %276 = sst [smem:[%s275_s14]] %s1408_s28  ;;  %v169_v51 = vcvt.f32.s32 %v163_v38 }
 0x166   : > { %v165_v41 = vsel %vm164_vm9, %v160_v39, inf  ;;  %s752_s16 = sadd.s32 4294967294, %s1408_s28  ;;  %v296_v44 = vstv %s1410_s13  ;;  %s447_s14 = scalar_lea.smem %s1092_s5, 131 [#allocation6] }
 0x167   : > { %166 = vmin.xlane.f32.xlu0 %v165_v41  ;;  %p285_p5 = scmp.gt.s32.totalorder %s752_s16, 0  ;;  %vm1100_vm11 = vcmp.lt.s32.totalorder %v1079_v25, %v296_v44  ;;  %vm1105_vm12 = vcmp.lt.s32.totalorder %v1082_v26, %v296_v44  ;;  %v170_v55 = vshll.u32 %v169_v51, 16 }
 0x168   : > { %v178_v42 = vpop.xlane.xlu1 %177 }
 0x169   : > { %vm179_vm10 = vcmp.eq.f32.partialorder %v1076_v20, %v178_v42  ;;  %s1412_s16 = smov (!%p285_p5, %s752_s16), 0  ;;  %v184_v53 = vcvt.f32.s32 %v178_v42 }
 0x16a   : > { %v180_v45 = vsel %vm179_vm10, %v175_v43, inf  ;;  %v293_v47 = vstv %s1412_s16 }
 0x16b   : > { %181 = vmin.xlane.f32.xlu1 %v180_v45  ;;  %vm1110_vm13 = vcmp.ge.s32.totalorder %v1079_v25, %v293_v47  ;;  %vm1115_vm14 = vcmp.ge.s32.totalorder %v1082_v26, %v293_v47  ;;  %v185_v58 = vshll.u32 %v184_v53, 16 }
 0x16c   : > { %vm299_vm15 = vmand %vm1110_vm13, %vm1100_vm11 }
 0x16d   : > { %vm300_vm1 = vmand %vm1115_vm14, %vm1105_vm12 }
 0x1f4   : > { %v167_v52 = vpop.xlane.xlu0 %166 }
 0x1f5   : > { %v168_v54 = vcvt.f32.s32 %v167_v52 }
 0x1f7   : > { %v171_v59 = vadd.s32 %v170_v55, %v168_v54 }
 0x1f8   : > { %v182_v56 = vpop.xlane.xlu1 %181 }
 0x1f9   : > { %v183_v60 = vcvt.f32.s32 %v182_v56  ;;  %v215_v62 = vsel %vm213_vm2, %v171_v59, 16 }
 0x1fb   : > { %v186_v61 = vadd.s32 %v185_v58, %v183_v60 }
 0x1fd   : > { %v216_v63 = vsel %vm214_vm3, %v186_v61, 16 }
 0x1fe   : > { %vm217_vm4 = vcmp.lt.s32.totalorder %v215_v62, %v216_v63 }
 0x1ff   : > { %v218_v0 = vsel %vm217_vm4, %v215_v62, %v216_v63 }
 0x200   : > { %v219_v1 = vrot.slane %v218_v0, 4 }
 0x202   : > { %vm220_vm5 = vcmp.lt.s32.totalorder %v218_v0, %v219_v1 }
 0x203   : > { %v221_v4 = vsel %vm220_vm5, %v218_v0, %v219_v1 }
 0x204   : > { %v222_v5 = vrot.slane %v221_v4, 2 }
 0x206   : > { %vm223_vm6 = vcmp.lt.s32.totalorder %v221_v4, %v222_v5 }
 0x207   : > { %v224_v6 = vsel %vm223_vm6, %v221_v4, %v222_v5 }
 0x208   : > { %v225_v8 = vrot.slane %v224_v6, 1 }
 0x20a   : > { %vm226_vm7 = vcmp.lt.s32.totalorder %v224_v6, %v225_v8 }
 0x20b   : > { %v227_v9 = vsel %vm226_vm7, %v224_v6, %v225_v8 }
 0x20c   : > { %782 = vpush %v227_v9 }
 0x23d   : > { %s783_s20 = spop %782 }
 0x23e   : > { %s743_s21 = sadd.s32 4294967292, %s783_s20  ;;  %s235_s22 = sadd.s32 4, %s783_s20 }
 0x23f   : > { %p230_p9 = scmp.gt.s32.totalorder %s743_s21, 0  ;;  %p236_p0 = scmp.lt.s32.totalorder %s235_s22, 16 }
 0x240   : > { %s443_s20 = scalar_lea.smem %s1092_s5, 129 [#allocation6] }
 0x241   : > { %s1414_s21 = smov (!%p230_p9, %s743_s21), 0  ;;  %s1416_s22 = smov (!%p236_p0, %s235_s22), 16 }
 0x242   : > { %p243_p2 = scmp.eq.s32.totalorder %s1414_s21, 0  ;;  %s246_s24 = sadd.s32 8, %s1414_s21 }
 0x243   : > { %s241_s26 = ssub.s32 %s1416_s22, %s1414_s21  ;;  %p247_p6 = scmp.lt.s32.totalorder %s246_s24, 16 }
 0x244   : > { %p242_p10 = scmp.lt.s32.totalorder %s241_s26, 8  ;;  %p250_p11 = scmp.ne.s32.totalorder %s1414_s21, 0 }
 0x245   : > { %s1418_s24 = smov (!%p247_p6, %s246_s24), 16  ;;  %s746_s30 = sadd.s32 4294967288, %s1416_s22 }
 0x246   : > { %p244_p12 = pnand %p243_p2, %p242_p10  ;;  %p251_p7 = pnand %p250_p11, %p242_p10 }
 0x247   : > { %p254_p8 = scmp.gt.s32.totalorder %s746_s30, 0 }
 0x248   : > { %s1420_s22 = smov (!%p244_p12, %s1416_s22), %s1418_s24 }
 0x249   : > { %278 = sst [smem:[%s277_s17]] %s1420_s22  ;;  %s287_s25 = sadd.s32 2, %s1420_s22 }
 0x24a   : > { %s1422_s30 = smov (!%p254_p8, %s746_s30), 0  ;;  %p288_p13 = scmp.lt.s32.totalorder %s287_s25, 16 }
 0x24b   : > { %s1424_s21 = smov (!%p251_p7, %s1414_s21), %s1422_s30 }
 0x24c   : > { %s1426_s25 = smov (!%p288_p13, %s287_s25), 16  ;;  %274 = sst [smem:[%s1092_s5]] %s1424_s21 }
 0x24d   : > { %s751_s27 = sadd.s32 4294967294, %s1424_s21  ;;  %v305_v10 = vstv %s1426_s25 }
 0x24e   : > { %p282_p1 = scmp.gt.s32.totalorder %s751_s27, 0  ;;  %vm306_vm9 = vcmp.lt.s32.totalorder %v1059_v7, %v305_v10 }
 0x250   : > { %s1428_s27 = smov (!%p282_p1, %s751_s27), 0 }
 0x251   : > { %v301_v11 = vstv %s1428_s27  ;;  %s445_s27 = scalar_lea.smem %s1092_s5, 130 [#allocation6] }
 0x252   : > { %vm302_vm8 = vcmp.ge.s32.totalorder %v1059_v7, %v301_v11 }
 0x253   : > { %vm303_vm10 = vmand %vm299_vm15, %vm302_vm8 }
 0x254   : > { %vm304_vm2 = vmand %vm300_vm1, %vm302_vm8 }
 0x255   : > { %vm307_vm3 = vmand %vm303_vm10, %vm306_vm9 }
 0x256   : > { %vm308_vm4 = vmand %vm304_vm2, %vm306_vm9  ;;  %v309_v12 = vsel %vm307_vm3, -inf, %v1051_v2 }
 0x257   : > { %v310_v13 = vsel %vm308_vm4, -inf, %v1053_v3  ;;  %311 = vst.msk [vmem:[#allocation2] sm:$0xff] %vm142_vm0, %v309_v12 }
 0x258   : > { %312 = vst.msk [vmem:[#allocation2 + $0x8] sm:$0xff] %vm142_vm0, %v310_v13 }
 0x25e   : > { %v1148_v14 = vld [vmem:[#allocation2] sm:$0xff] }
 0x25f   : > { %v1150_v15 = vld [vmem:[#allocation2 + $0x8] sm:$0xff]  ;;  %v315_v16 = vsel %vm142_vm0, %v1148_v14, -inf }
 0x260   : > { %v318_v17 = vsel %vm142_vm0, %v1150_v15, -inf  ;;  %316 = vmax.xlane.f32.xlu0 %v315_v16 }
 0x261   : > { %319 = vmax.xlane.f32.xlu1 %v318_v17 }
 0x2ed   : > { %v317_v18 = vpop.xlane.xlu0 %316 }
 0x2ee   : > { %v320_v2 = vpop.xlane.xlu1 %319  ;;  %vm321_vm11 = vcmp.eq.f32.partialorder %v1148_v14, %v317_v18 }
 0x2ef   : > { %vm322_vm12 = vcmp.eq.f32.partialorder %v1150_v15, %v320_v2  ;;  %v355_v3 = vmax.f32 %v317_v18, %v320_v2  ;;  %v323_v19 = vsel %vm321_vm11, %v1059_v7, 16 }
 0x2f0   : > { %v324_v20 = vsel %vm322_vm12, %v1059_v7, 16  ;;  %v325_v21 = vsel %vm142_vm0, %v323_v19, 2147483647 }
 0x2f1   : > { %v356_v22 = vrot.slane %v355_v3, 4  ;;  %v1162_v23 = vsel %vm142_vm0, %v324_v20, 2147483647  ;;  %v327_v24 = vshra.s32 %v325_v21, 16  ;;  %v326_v45 = vand.u32 65535, %v325_v21 }
 0x2f2   : > { %v342_v27 = vshra.s32 %v1162_v23, 16  ;;  %v341_v46 = vand.u32 65535, %v1162_v23 }
 0x2f3   : > { %v1165_v28 = vcvt.s32.f32 %v327_v24  ;;  %v357_v29 = vmax.f32 %v355_v3, %v356_v22  ;;  %v328_v48 = vcvt.s32.f32 %v326_v45 }
 0x2f4   : > { %v1167_v30 = vcvt.s32.f32 %v342_v27  ;;  %v343_v50 = vcvt.s32.f32 %v341_v46 }
 0x2f5   : > { %330 = vmin.xlane.f32.xlu0 %v1165_v28  ;;  %v358_v31 = vrot.slane %v357_v29, 2 }
 0x2f6   : > { %345 = vmin.xlane.f32.xlu1 %v1167_v30 }
 0x2f7   : > { %v359_v32 = vmax.f32 %v357_v29, %v358_v31 }
 0x2f9   : > { %v360_v33 = vrot.slane %v359_v32, 1 }
 0x2fb   : > { %v361_v34 = vmax.f32 %v359_v32, %v360_v33 }
 0x2fd   : > { %784 = vpush %v361_v34 }
 0x32e   : > { %s785_s28 = spop %784 }
 0x32f   : > { %v363_v35 = vstv %s785_s28 }
 0x330   : > { %vm364_vm13 = vcmp.eq.f32.partialorder %v317_v18, %v363_v35  ;;  %vm365_vm14 = vcmp.eq.f32.partialorder %v320_v2, %v363_v35 }
 0x331   : > { %v366_v36 = vsel %vm364_vm13, %v1079_v25, 16  ;;  %v367_v37 = vsel %vm365_vm14, %v1082_v26, 16 }
 0x332   : > { %vm368_vm15 = vcmp.lt.s32.totalorder %v366_v36, %v367_v37 }
 0x333   : > { %v369_v38 = vsel %vm368_vm15, %v366_v36, %v367_v37 }
 0x334   : > { %v370_v39 = vrot.slane %v369_v38, 4 }
 0x336   : > { %vm371_vm1 = vcmp.lt.s32.totalorder %v369_v38, %v370_v39 }
 0x337   : > { %v372_v40 = vsel %vm371_vm1, %v369_v38, %v370_v39 }
 0x338   : > { %v373_v41 = vrot.slane %v372_v40, 2 }
 0x33a   : > { %vm374_vm5 = vcmp.lt.s32.totalorder %v372_v40, %v373_v41 }
 0x33b   : > { %v375_v42 = vsel %vm374_vm5, %v372_v40, %v373_v41 }
 0x33c   : > { %v376_v43 = vrot.slane %v375_v42, 1 }
 0x33e   : > { %vm377_vm6 = vcmp.lt.s32.totalorder %v375_v42, %v376_v43 }
 0x33f   : > { %v378_v44 = vsel %vm377_vm6, %v375_v42, %v376_v43 }
 0x340   : > { %786 = vpush %v378_v44 }
 0x371   : > { %s1173_s29 = spop %786 }
 0x372   : > { %s754_s2 = sadd.s32 4294967292, %s1173_s29  ;;  %s406_s3 = sadd.s32 4, %s1173_s29  ;;  %v380_v62 = vstv %s1173_s29 }
 0x373   : > { %p401_p3 = scmp.gt.s32.totalorder %s754_s2, 0  ;;  %p407_p4 = scmp.lt.s32.totalorder %s406_s3, 16  ;;  %vm381_vm12 = vcmp.eq.s32.totalorder %v1079_v25, %v380_v62  ;;  %vm382_vm13 = vcmp.eq.s32.totalorder %v1082_v26, %v380_v62 }
 0x374   : > { %s441_s29 = scalar_lea.smem %s1092_s5, 128 [#allocation6] }
 0x375   : > { %s1430_s2 = smov (!%p401_p3, %s754_s2), 0  ;;  %s1432_s3 = smov (!%p407_p4, %s406_s3), 16 }
 0x376   : > { %p427_p5 = scmp.eq.s32.totalorder %s1430_s2, 0  ;;  %s430_s4 = sadd.s32 8, %s1430_s2 }
 0x377   : > { %s425_s11 = ssub.s32 %s1432_s3, %s1430_s2  ;;  %p431_p9 = scmp.lt.s32.totalorder %s430_s4, 16 }
 0x378   : > { %p426_p0 = scmp.lt.s32.totalorder %s425_s11, 8  ;;  %p434_p2 = scmp.ne.s32.totalorder %s1430_s2, 0 }
 0x379   : > { %s1434_s4 = smov (!%p431_p9, %s430_s4), 16  ;;  %s759_s13 = sadd.s32 4294967288, %s1432_s3 }
 0x37a   : > { %p428_p6 = pnand %p427_p5, %p426_p0  ;;  %p435_p10 = pnand %p434_p2, %p426_p0 }
 0x37b   : > { %p438_p11 = scmp.gt.s32.totalorder %s759_s13, 0 }
 0x37c   : > { %s1436_s3 = smov (!%p428_p6, %s1432_s3), %s1434_s4 }
 0x37d   : > { %448 = sst [smem:[%s447_s14]] %s1436_s3  ;;  %s458_s16 = sadd.s32 2, %s1436_s3 }
 0x37e   : > { %s1438_s13 = smov (!%p438_p11, %s759_s13), 0  ;;  %p459_p12 = scmp.lt.s32.totalorder %s458_s16, 16 }
 0x37f   : > { %s1440_s2 = smov (!%p435_p10, %s1430_s2), %s1438_s13 }
 0x380   : > { %s1442_s16 = smov (!%p459_p12, %s458_s16), 16  ;;  %444 = sst [smem:[%s443_s20]] %s1440_s2 }
 0x381   : > { %s762_s21 = sadd.s32 4294967294, %s1440_s2  ;;  %v464_v52 = vstv %s1442_s16 }
 0x382   : > { %v331_v47 = vpop.xlane.xlu0 %330  ;;  %p453_p7 = scmp.gt.s32.totalorder %s762_s21, 0  ;;  %vm1183_vm9 = vcmp.lt.s32.totalorder %v1079_v25, %v464_v52  ;;  %vm1188_vm10 = vcmp.lt.s32.totalorder %v1082_v26, %v464_v52 }
 0x383   : > { %v346_v49 = vpop.xlane.xlu1 %345  ;;  %vm332_vm7 = vcmp.eq.f32.partialorder %v1165_v28, %v331_v47  ;;  %v337_v59 = vcvt.f32.s32 %v331_v47 }
 0x384   : > { %vm347_vm8 = vcmp.eq.f32.partialorder %v1167_v30, %v346_v49  ;;  %v333_v51 = vsel %vm332_vm7, %v328_v48, inf  ;;  %s1444_s21 = smov (!%p453_p7, %s762_s21), 0  ;;  %v352_v60 = vcvt.f32.s32 %v346_v49 }
 0x385   : > { %v348_v53 = vsel %vm347_vm8, %v343_v50, inf  ;;  %334 = vmin.xlane.f32.xlu0 %v333_v51  ;;  %v461_v55 = vstv %s1444_s21  ;;  %v338_v63 = vshll.u32 %v337_v59, 16  ;;  %s615_s21 = scalar_lea.smem %s1092_s5, 259 [#allocation6] }
 0x386   : > { %349 = vmin.xlane.f32.xlu1 %v348_v53  ;;  %vm1193_vm2 = vcmp.ge.s32.totalorder %v1079_v25, %v461_v55  ;;  %vm1198_vm3 = vcmp.ge.s32.totalorder %v1082_v26, %v461_v55  ;;  %v353_v4 = vshll.u32 %v352_v60, 16 }
 0x387   : > { %vm467_vm4 = vmand %vm1193_vm2, %vm1183_vm9 }
 0x388   : > { %vm468_vm11 = vmand %vm1198_vm3, %vm1188_vm10 }
 0x412   : > { %v335_v61 = vpop.xlane.xlu0 %334 }
 0x413   : > { %v350_v0 = vpop.xlane.xlu1 %349  ;;  %v336_v1 = vcvt.f32.s32 %v335_v61 }
 0x414   : > { %v351_v5 = vcvt.f32.s32 %v350_v0 }
 0x415   : > { %v339_v6 = vadd.s32 %v338_v63, %v336_v1 }
 0x416   : > { %v354_v8 = vadd.s32 %v353_v4, %v351_v5 }
 0x417   : > { %v383_v9 = vsel %vm381_vm12, %v339_v6, 16 }
 0x418   : > { %v384_v10 = vsel %vm382_vm13, %v354_v8, 16 }
 0x419   : > { %vm385_vm14 = vcmp.lt.s32.totalorder %v383_v9, %v384_v10 }
 0x41a   : > { %v386_v11 = vsel %vm385_vm14, %v383_v9, %v384_v10 }
 0x41b   : > { %v387_v12 = vrot.slane %v386_v11, 4 }
 0x41d   : > { %vm388_vm15 = vcmp.lt.s32.totalorder %v386_v11, %v387_v12 }
 0x41e   : > { %v389_v13 = vsel %vm388_vm15, %v386_v11, %v387_v12 }
 0x41f   : > { %v390_v16 = vrot.slane %v389_v13, 2 }
 0x421   : > { %vm391_vm1 = vcmp.lt.s32.totalorder %v389_v13, %v390_v16 }
 0x422   : > { %v392_v17 = vsel %vm391_vm1, %v389_v13, %v390_v16 }
 0x423   : > { %v393_v18 = vrot.slane %v392_v17, 1 }
 0x425   : > { %vm394_vm5 = vcmp.lt.s32.totalorder %v392_v17, %v393_v18 }
 0x426   : > { %v395_v2 = vsel %vm394_vm5, %v392_v17, %v393_v18 }
 0x427   : > { %788 = vpush %v395_v2 }
 0x458   : > { %s789_s22 = spop %788 }
 0x459   : > { %s753_s24 = sadd.s32 4294967292, %s789_s22  ;;  %s403_s26 = sadd.s32 4, %s789_s22 }
 0x45a   : > { %p398_p8 = scmp.gt.s32.totalorder %s753_s24, 0  ;;  %p404_p13 = scmp.lt.s32.totalorder %s403_s26, 16 }
 0x45c   : > { %s1446_s24 = smov (!%p398_p8, %s753_s24), 0  ;;  %s1448_s26 = smov (!%p404_p13, %s403_s26), 16 }
 0x45d   : > { %p411_p1 = scmp.eq.s32.totalorder %s1446_s24, 0  ;;  %s414_s30 = sadd.s32 8, %s1446_s24 }
 0x45e   : > { %s409_s17 = ssub.s32 %s1448_s26, %s1446_s24  ;;  %p415_p3 = scmp.lt.s32.totalorder %s414_s30, 16 }
 0x45f   : > { %p410_p4 = scmp.lt.s32.totalorder %s409_s17, 8  ;;  %p418_p5 = scmp.ne.s32.totalorder %s1446_s24, 0 }
 0x460   : > { %s1450_s30 = smov (!%p415_p3, %s414_s30), 16  ;;  %s756_s25 = sadd.s32 4294967288, %s1448_s26 }
 0x461   : > { %p412_p9 = pnand %p411_p1, %p410_p4  ;;  %p419_p0 = pnand %p418_p5, %p410_p4 }
 0x462   : > { %p422_p2 = scmp.gt.s32.totalorder %s756_s25, 0 }
 0x463   : > { %s1452_s26 = smov (!%p412_p9, %s1448_s26), %s1450_s30  ;;  %s609_s30 = scalar_lea.smem %s1092_s5, 256 [#allocation6] }
 0x464   : > { %446 = sst [smem:[%s445_s27]] %s1452_s26  ;;  %s455_s28 = sadd.s32 2, %s1452_s26 }
 0x465   : > { %s1454_s25 = smov (!%p422_p2, %s756_s25), 0  ;;  %p456_p6 = scmp.lt.s32.totalorder %s455_s28, 16 }
 0x466   : > { %s1456_s24 = smov (!%p419_p0, %s1446_s24), %s1454_s25  ;;  %s774_s25 = sshll.u32 %s957_s10, 2 }
 0x467   : > { %s1458_s28 = smov (!%p456_p6, %s455_s28), 16  ;;  %442 = sst [smem:[%s441_s29]] %s1456_s24 }
 0x468   : > { %s761_s2 = sadd.s32 4294967294, %s1456_s24  ;;  %v473_v3 = vstv %s1458_s28  ;;  %s611_s24 = scalar_lea.smem %s1092_s5, 257 [#allocation6] }
 0x469   : > { %p450_p10 = scmp.gt.s32.totalorder %s761_s2, 0  ;;  %vm474_vm7 = vcmp.lt.s32.totalorder %v1059_v7, %v473_v3  ;;  %s613_s29 = scalar_lea.smem %s1092_s5, 258 [#allocation6] }
 0x46b   : > { %s1460_s2 = smov (!%p450_p10, %s761_s2), 0 }
 0x46c   : > { %v469_v19 = vstv %s1460_s2 }
 0x46d   : > { %vm470_vm6 = vcmp.ge.s32.totalorder %v1059_v7, %v469_v19 }
 0x46e   : > { %vm471_vm8 = vmand %vm467_vm4, %vm470_vm6 }
 0x46f   : > { %vm472_vm12 = vmand %vm468_vm11, %vm470_vm6 }
 0x470   : > { %vm475_vm13 = vmand %vm471_vm8, %vm474_vm7 }
 0x471   : > { %vm476_vm14 = vmand %vm472_vm12, %vm474_vm7  ;;  %v477_v20 = vsel %vm475_vm13, -inf, %v1148_v14 }
 0x472   : > { %v478_v21 = vsel %vm476_vm14, -inf, %v1150_v15  ;;  %479 = vst.msk [vmem:[#allocation2] sm:$0xff] %vm142_vm0, %v477_v20 }
 0x473   : > { %480 = vst.msk [vmem:[#allocation2 + $0x8] sm:$0xff] %vm142_vm0, %v478_v21 }
 0x479   : > { %v1231_v22 = vld [vmem:[#allocation2] sm:$0xff] }
 0x47a   : > { %v1233_v23 = vld [vmem:[#allocation2 + $0x8] sm:$0xff]  ;;  %v483_v24 = vsel %vm142_vm0, %v1231_v22, -inf }
 0x47b   : > { %v486_v27 = vsel %vm142_vm0, %v1233_v23, -inf  ;;  %484 = vmax.xlane.f32.xlu0 %v483_v24 }
 0x47c   : > { %487 = vmax.xlane.f32.xlu1 %v486_v27 }
 0x508   : > { %v485_v28 = vpop.xlane.xlu0 %484 }
 0x509   : > { %v488_v14 = vpop.xlane.xlu1 %487  ;;  %vm489_vm9 = vcmp.eq.f32.partialorder %v1231_v22, %v485_v28 }
 0x50a   : > { %vm490_vm10 = vcmp.eq.f32.partialorder %v1233_v23, %v488_v14  ;;  %v523_v15 = vmax.f32 %v485_v28, %v488_v14  ;;  %v491_v29 = vsel %vm489_vm9, %v1059_v7, 16 }
 0x50b   : > { %v492_v30 = vsel %vm490_vm10, %v1059_v7, 16  ;;  %v493_v31 = vsel %vm142_vm0, %v491_v29, 2147483647 }
 0x50c   : > { %v524_v32 = vrot.slane %v523_v15, 4  ;;  %v1245_v33 = vsel %vm142_vm0, %v492_v30, 2147483647  ;;  %v495_v34 = vshra.s32 %v493_v31, 16  ;;  %v494_v53 = vand.u32 65535, %v493_v31 }
 0x50d   : > { %v510_v35 = vshra.s32 %v1245_v33, 16  ;;  %v509_v54 = vand.u32 65535, %v1245_v33 }
 0x50e   : > { %v1248_v36 = vcvt.s32.f32 %v495_v34  ;;  %v525_v37 = vmax.f32 %v523_v15, %v524_v32  ;;  %v496_v56 = vcvt.s32.f32 %v494_v53 }
 0x50f   : > { %v1250_v38 = vcvt.s32.f32 %v510_v35  ;;  %v511_v58 = vcvt.s32.f32 %v509_v54 }
 0x510   : > { %498 = vmin.xlane.f32.xlu0 %v1248_v36  ;;  %v526_v39 = vrot.slane %v525_v37, 2 }
 0x511   : > { %513 = vmin.xlane.f32.xlu1 %v1250_v38 }
 0x512   : > { %v527_v40 = vmax.f32 %v525_v37, %v526_v39 }
 0x514   : > { %v528_v41 = vrot.slane %v527_v40, 1 }
 0x516   : > { %v529_v42 = vmax.f32 %v527_v40, %v528_v41 }
 0x518   : > { %790 = vpush %v529_v42 }
 0x549   : > { %s791_s3 = spop %790 }
 0x54a   : > { %v531_v43 = vstv %s791_s3 }
 0x54b   : > { %vm532_vm2 = vcmp.eq.f32.partialorder %v485_v28, %v531_v43  ;;  %vm533_vm3 = vcmp.eq.f32.partialorder %v488_v14, %v531_v43 }
 0x54c   : > { %v534_v44 = vsel %vm532_vm2, %v1079_v25, 16  ;;  %v535_v45 = vsel %vm533_vm3, %v1082_v26, 16 }
 0x54d   : > { %vm536_vm4 = vcmp.lt.s32.totalorder %v534_v44, %v535_v45 }
 0x54e   : > { %v537_v46 = vsel %vm536_vm4, %v534_v44, %v535_v45 }
 0x54f   : > { %v538_v47 = vrot.slane %v537_v46, 4 }
 0x551   : > { %vm539_vm11 = vcmp.lt.s32.totalorder %v537_v46, %v538_v47 }
 0x552   : > { %v540_v48 = vsel %vm539_vm11, %v537_v46, %v538_v47 }
 0x553   : > { %v541_v49 = vrot.slane %v540_v48, 2 }
 0x555   : > { %vm542_vm15 = vcmp.lt.s32.totalorder %v540_v48, %v541_v49 }
 0x556   : > { %v543_v50 = vsel %vm542_vm15, %v540_v48, %v541_v49 }
 0x557   : > { %v544_v51 = vrot.slane %v543_v50, 1 }
 0x559   : > { %vm545_vm1 = vcmp.lt.s32.totalorder %v543_v50, %v544_v51 }
 0x55a   : > { %v546_v52 = vsel %vm545_vm1, %v543_v50, %v544_v51 }
 0x55b   : > { %792 = vpush %v546_v52 }
 0x58c   : > { %s1256_s4 = spop %792 }
 0x58d   : > { %s764_s11 = sadd.s32 4294967292, %s1256_s4  ;;  %s574_s13 = sadd.s32 4, %s1256_s4  ;;  %v548_v9 = vstv %s1256_s4 }
 0x58e   : > { %p569_p11 = scmp.gt.s32.totalorder %s764_s11, 0  ;;  %p575_p12 = scmp.lt.s32.totalorder %s574_s13, 16  ;;  %vm549_vm10 = vcmp.eq.s32.totalorder %v1079_v25, %v548_v9  ;;  %vm550_vm2 = vcmp.eq.s32.totalorder %v1082_v26, %v548_v9 }
 0x58f   : > { %s661_s4 = scalar_lea.vmem %s1356_s1, %s774_s25  ;;  %s873_s25 = sshll.u32 %s1356_s1, 4  ;;  %s874_s25 = int_to_ptr.vmem [resolvable:$false] %s873_s25 }
 0x590   : > { %s1462_s11 = smov (!%p569_p11, %s764_s11), 0  ;;  %s1464_s13 = smov (!%p575_p12, %s574_s13), 16 }
 0x591   : > { %p595_p7 = scmp.eq.s32.totalorder %s1462_s11, 0  ;;  %s598_s14 = sadd.s32 8, %s1462_s11 }
 0x592   : > { %s593_s16 = ssub.s32 %s1464_s13, %s1462_s11  ;;  %p599_p8 = scmp.lt.s32.totalorder %s598_s14, 16 }
 0x593   : > { %p594_p13 = scmp.lt.s32.totalorder %s593_s16, 8  ;;  %p602_p1 = scmp.ne.s32.totalorder %s1462_s11, 0 }
 0x594   : > { %s1466_s14 = smov (!%p599_p8, %s598_s14), 16  ;;  %s769_s20 = sadd.s32 4294967288, %s1464_s13 }
 0x595   : > { %p596_p3 = pnand %p595_p7, %p594_p13  ;;  %p603_p4 = pnand %p602_p1, %p594_p13 }
 0x596   : > { %p606_p5 = scmp.gt.s32.totalorder %s769_s20, 0  ;;  %s663_s10 = sshll.u32 %s661_s4, 4  ;;  %s664_s10 = int_to_ptr.vmem [resolvable:$true] %s663_s10 }
 0x597   : > { %s1468_s13 = smov (!%p596_p3, %s1464_s13), %s1466_s14 }
 0x598   : > { %616 = sst [smem:[%s615_s21]] %s1468_s13  ;;  %s626_s22 = sadd.s32 2, %s1468_s13 }
 0x599   : > { %s1470_s20 = smov (!%p606_p5, %s769_s20), 0  ;;  %p627_p9 = scmp.lt.s32.totalorder %s626_s22, 16 }
 0x59a   : > { %s1472_s11 = smov (!%p603_p4, %s1462_s11), %s1470_s20 }
 0x59b   : > { %s1474_s22 = smov (!%p627_p9, %s626_s22), 16  ;;  %612 = sst [smem:[%s611_s24]] %s1472_s11 }
 0x59c   : > { %s772_s26 = sadd.s32 4294967294, %s1472_s11  ;;  %v632_v60 = vstv %s1474_s22  ;;  %s650_s22 = scalar_lea.sflag [#allocation5], %s1041_s23 }
 0x59d   : > { %v499_v55 = vpop.xlane.xlu0 %498  ;;  %p621_p0 = scmp.gt.s32.totalorder %s772_s26, 0  ;;  %vm1266_vm7 = vcmp.lt.s32.totalorder %v1079_v25, %v632_v60  ;;  %vm1271_vm8 = vcmp.lt.s32.totalorder %v1082_v26, %v632_v60  ;;  %s869_s24 = scalar_lea.vmem %s664_s10, 64 }
 0x59e   : > { %v514_v57 = vpop.xlane.xlu1 %513  ;;  %vm500_vm5 = vcmp.eq.f32.partialorder %v1248_v36, %v499_v55  ;;  %v505_v5 = vcvt.f32.s32 %v499_v55  ;;  %p870_p5 = scmp.ne.s32.totalorder %s664_s10, %s869_s24  ;;  %p1390_p9 = scmp.ne.s32.totalorder %s1362_s18, 0 }
 0x59f   : > { %vm515_vm6 = vcmp.eq.f32.partialorder %v1250_v38, %v514_v57  ;;  %v501_v59 = vsel %vm500_vm5, %v496_v56, inf  ;;  %s1476_s26 = smov (!%p621_p0, %s772_s26), 0  ;;  %v520_v6 = vcvt.f32.s32 %v514_v57 }
 0x5a0   : > { %v516_v61 = vsel %vm515_vm6, %v511_v58, inf  ;;  %502 = vmin.xlane.f32.xlu0 %v501_v59  ;;  %v629_v0 = vstv %s1476_s26  ;;  %v506_v10 = vshll.u32 %v505_v5, 16  ;;  %p871_p0 = pnand %p870_p5, %p1390_p9 }
 0x5a1   : > { %517 = vmin.xlane.f32.xlu1 %v516_v61  ;;  %vm1276_vm12 = vcmp.ge.s32.totalorder %v1079_v25, %v629_v0  ;;  %vm1281_vm13 = vcmp.ge.s32.totalorder %v1082_v26, %v629_v0  ;;  %v521_v13 = vshll.u32 %v520_v6, 16 }
 0x5a2   : > { %vm635_vm14 = vmand %vm1276_vm12, %vm1266_vm7 }
 0x5a3   : > { %vm636_vm9 = vmand %vm1281_vm13, %vm1271_vm8 }
 0x62d   : > { %v503_v8 = vpop.xlane.xlu0 %502 }
 0x62e   : > { %v518_v11 = vpop.xlane.xlu1 %517  ;;  %v504_v12 = vcvt.f32.s32 %v503_v8 }
 0x62f   : > { %v519_v16 = vcvt.f32.s32 %v518_v11 }
 0x630   : > { %v507_v17 = vadd.s32 %v506_v10, %v504_v12 }
 0x631   : > { %v522_v18 = vadd.s32 %v521_v13, %v519_v16 }
 0x632   : > { %v551_v2 = vsel %vm549_vm10, %v507_v17, 16 }
 0x633   : > { %v552_v3 = vsel %vm550_vm2, %v522_v18, 16 }
 0x634   : > { %vm553_vm3 = vcmp.lt.s32.totalorder %v551_v2, %v552_v3 }
 0x635   : > { %v554_v19 = vsel %vm553_vm3, %v551_v2, %v552_v3 }
 0x636   : > { %v555_v20 = vrot.slane %v554_v19, 4 }
 0x638   : > { %vm556_vm4 = vcmp.lt.s32.totalorder %v554_v19, %v555_v20 }
 0x639   : > { %v557_v21 = vsel %vm556_vm4, %v554_v19, %v555_v20 }
 0x63a   : > { %v558_v24 = vrot.slane %v557_v21, 2 }
 0x63c   : > { %vm559_vm11 = vcmp.lt.s32.totalorder %v557_v21, %v558_v24 }
 0x63d   : > { %v560_v27 = vsel %vm559_vm11, %v557_v21, %v558_v24 }
 0x63e   : > { %v561_v28 = vrot.slane %v560_v27, 1 }
 0x640   : > { %vm562_vm15 = vcmp.lt.s32.totalorder %v560_v27, %v561_v28 }
 0x641   : > { %v563_v14 = vsel %vm562_vm15, %v560_v27, %v561_v28 }
 0x642   : > { %794 = vpush %v563_v14 }
 0x673   : > { %s795_s17 = spop %794 }
 0x674   : > { %s763_s27 = sadd.s32 4294967292, %s795_s17  ;;  %s571_s28 = sadd.s32 4, %s795_s17 }
 0x675   : > { %p566_p2 = scmp.gt.s32.totalorder %s763_s27, 0  ;;  %p572_p6 = scmp.lt.s32.totalorder %s571_s28, 16 }
 0x677   : > { %s1478_s27 = smov (!%p566_p2, %s763_s27), 0  ;;  %s1480_s28 = smov (!%p572_p6, %s571_s28), 16 }
 0x678   : > { %p579_p10 = scmp.eq.s32.totalorder %s1478_s27, 0  ;;  %s582_s11 = sadd.s32 8, %s1478_s27 }
 0x679   : > { %s577_s13 = ssub.s32 %s1480_s28, %s1478_s27  ;;  %p583_p11 = scmp.lt.s32.totalorder %s582_s11, 16 }
 0x67a   : > { %p578_p12 = scmp.lt.s32.totalorder %s577_s13, 8  ;;  %p586_p7 = scmp.ne.s32.totalorder %s1478_s27, 0 }
 0x67b   : > { %s1482_s11 = smov (!%p583_p11, %s582_s11), 16  ;;  %s766_s14 = sadd.s32 4294967288, %s1480_s28 }
 0x67c   : > { %p580_p8 = pnand %p579_p10, %p578_p12  ;;  %p587_p13 = pnand %p586_p7, %p578_p12 }
 0x67d   : > { %p590_p1 = scmp.gt.s32.totalorder %s766_s14, 0  ;;  %p872_p2 = pneg %p871_p0 }
 0x67e   : > { %s1484_s28 = smov (!%p580_p8, %s1480_s28), %s1482_s11  ;;  %p876_p6 = scmp.lt.s32.totalorder %s664_s10, %s874_s25 }
 0x67f   : > { %614 = sst [smem:[%s613_s29]] %s1484_s28  ;;  %s623_s16 = sadd.s32 2, %s1484_s28 }
 0x680   : > { %s1486_s14 = smov (!%p590_p1, %s766_s14), 0  ;;  %p624_p3 = scmp.lt.s32.totalorder %s623_s16, 16 }
 0x681   : > { %s1488_s27 = smov (!%p587_p13, %s1478_s27), %s1486_s14  ;;  %s875_s28 = scalar_lea.vmem %s874_s25, 128 }
 0x682   : > { %s1490_s16 = smov (!%p624_p3, %s623_s16), 16  ;;  %610 = sst [smem:[%s609_s30]] %s1488_s27 }
 0x683   : > { %s771_s20 = sadd.s32 4294967294, %s1488_s27  ;;  %p877_p10 = scmp.lt.s32.totalorder %s875_s28, %s869_s24 }
 0x684   : > { %p1304_p4 = scmp.gt.s32.totalorder %s771_s20, 0 }
 0x685   : > { %p878_p11 = por %p877_p10, %p876_p6 }
 0x687   : > { %p879_p12 = pnand %p878_p11, %p872_p2 }
 0x689   : > { %882 = shalt.err (!%p879_p12)
}
 0x68a   : > { %798 = dma.smem_to_vmem (%p1390_p9), %s1092_s5, 64, %s664_s10, %s650_s22   ;;  %v641_v25 = vstv %s1490_s16 }
 0x68b   : > { %s1492_s20 = smov (!%p1304_p4, %s771_s20), 0  ;;  %vm642_vm5 = vcmp.lt.s32.totalorder %v1059_v7, %v641_v25 }
 0x68c   : > { %v637_v26 = vstv %s1492_s20 }
 0x68d   : > { %vm638_vm1 = vcmp.ge.s32.totalorder %v1059_v7, %v637_v26 }
 0x68e   : > { %vm639_vm6 = vmand %vm635_vm14, %vm638_vm1 }
 0x68f   : > { %vm640_vm10 = vmand %vm636_vm9, %vm638_vm1 }
 0x690   : > { %vm643_vm2 = vmand %vm639_vm6, %vm642_vm5 }
 0x691   : > { %vm644_vm3 = vmand %vm640_vm10, %vm642_vm5  ;;  %v645_v15 = vsel %vm643_vm2, -inf, %v1231_v22 }
 0x692   : > { %v646_v29 = vsel %vm644_vm3, -inf, %v1233_v23  ;;  %647 = vst.msk [vmem:[#allocation2] sm:$0xff] %vm142_vm0, %v645_v15 }
 0x693   : > { %648 = vst.msk [vmem:[#allocation2 + $0x8] sm:$0xff] %vm142_vm0, %v646_v29 }
 0x694 PF: > { %p1391_p7 = scmp.lt.s32.totalorder %s921_s9, 2 }
 0x695   : > { %s675_s18 = sand.u32 (!%p1391_p7), 1, %s909_s6   ;;  %p1392_p8 = scmp.ne.s32.totalorder (!%p1391_p7), %s1363_s19, 0 }
 0x696   : > { %670 = sbr.rel (%p1391_p7) target bundleno = 1696 (0x6a0), region = 36  ;;  %s676_s23 = scalar_lea.sflag (!%p1391_p7), [#allocation5], %s675_s18 }
 0x69d   : > { %904 = dma.done.wait (%p1392_p8), %s676_s23, 64  }
 0x69e   : > { %906 = vsyncadd (%p1392_p8), %s676_s23, 4294967232 }
 0x69f   : > { %681 = sfence }
 0x6a0 PF: > { %p14_p13 = scmp.ge.s32.totalorder %s961_s12, 4   ;;  %s1393_s6 = smov %s913_s7 }
 0x6a1   : > { %s1394_s7 = smov %s917_s8  ;;  %s1395_s8 = smov %s973_s15 }
 0x6a2   : > { %s1396_s9 = smov %s961_s12  ;;  %16 = sbr.rel (!%p14_p13) target bundleno = 5 (0x5), region = 81 }
 0x6a9   :  { %682 = vsyncpa [#allocation4], 1 }
 0x6aa   :  { %684 = vsyncpa [#allocation4 + $0x1], 1 }
 0x6ab   :  { %685 = vsyncpa [#allocation5], 1 }
 0x6ac   :  { %687 = vsyncpa [#allocation5 + $0x1], 1 }

// kernel: _forward.3
= control target key start
LH: loop header
LB: loop body
LE: loop exit
PB: predicated region body
PF: predicated region fallthrough
CT: control target
= control target key end

     0   :  { %s4802_s0 = inlined_call_operand.vmem [shape: s32[2,3,4], index: 0, kind: input, shape index: {}]   ;;  %s4803_s1 = inlined_call_operand.vmem [shape: f32[12,8], index: 1, kind: input, shape index: {}]   ;;  %s4804_s2 = inlined_call_operand.hbm [shape: f32[2,4,16,16], index: 2, kind: input, shape index: {}]   ;;  %s4805_s3 = inlined_call_operand.vmem [shape: f32[2,3,12,48], index: 3, kind: output, shape index: {}]  }
   0x1   :  { %s8_s14 = sshll.u32 %s4802_s0, 4  ;;  %s9_s14 = int_to_ptr.vmem [resolvable:$true] %s8_s14 }
   0x2   :  { %s4320_s15 = scalar_lea.vmem %s9_s14, 128  ;;  %p4325_p1 = scmp.lt.s32.totalorder %s9_s14, %s9_s14 }
   0x3   :  { %p4321_p0 = scmp.ne.s32.totalorder %s9_s14, %s4320_s15  ;;  %p4326_p2 = scmp.lt.s32.totalorder %s4320_s15, %s4320_s15 }
   0x5   :  { %p4327_p3 = por %p4326_p2, %p4325_p1 }
   0x7   :  { %p4328_p4 = pnand %p4327_p3, %p4321_p0 }
   0x9   :  { %4331 = shalt.err (!%p4328_p4)  }
   0xa   :  { %s4400_s16 = smov [#allocation3]  }
   0xb   :  { %11 = dma.vmem_to_smem %s9_s14, 128, %s4400_s16, [#allocation2] }
   0xc   :  { %4378 = dma.done.wait [#allocation2], 128 }
   0xd   :  { %4379 = vsyncadd [#allocation2], 4294967168 }
   0xe   :  { %13 = sfence }
   0xf   :  { %14 = vsyncpa [#allocation5], 0 }
  0x10   :  { %16 = vsyncpa [#allocation5 + $0x1], 0  ;;  %s4430_s17 = smov 0   ;;  %s4432_s18 = smov 0  }
  0x11   :  { %s4434_s0 = smov 0   ;;  %s4436_s19 = smov 0  }
  0x12 LB: > { %s4449_s20 = sadd.s32 4294967295, %s4398_s19   ;;  %s4452_s21 = sadd.s32 1, %s4398_s19   ;;  %s4398_s19 = sphi %s4436_s19, %s4812_s19   ;;  %s4394_s0 = sphi %s4434_s0, %s4811_s0   ;;  %s4390_s18 = sphi %s4432_s18, %s4810_s18   ;;  %s4386_s17 = sphi %s4430_s17, %s4809_s17  }
  0x13   : > { %s47_s22 = ssub.s32 %s4398_s19, %s4452_s21  ;;  %s50_s23 = sadd.s32 1, %s4394_s0 }
  0x14   : > { %p48_p5 = scmp.eq.s32.totalorder %s47_s22, 0  ;;  %p57_p6 = scmp.ne.s32.totalorder %s4394_s0, %s4390_s18 }
  0x15   : > { %p58_p7 = scmp.eq.s32.totalorder %s4398_s19, 0  ;;  %p63_p8 = scmp.ne.s32.totalorder %s4390_s18, %s4386_s17 }
  0x16   : > { %s4462_s24 = scalar_select %p48_p5, %s4394_s0, %s50_s23  }
  0x17   : > { %p59_p9 = por %p58_p7, %p57_p6  ;;  %p64_p10 = scmp.eq.s32.totalorder %s4449_s20, 0 }
  0x18   : > { %p4281_p11 = scmp.lt.s32.totalorder %s4398_s19, 2  ;;  %s116_s26 = sand.u32 1, %s4394_s0  }
  0x19   : > { %p4466_p12 = por %p64_p10, %p63_p8  ;;  %s3655_s27 = sshll.u32 %s116_s26, 6 }
  0x1a   : > { %s3672_s28 = sshll.u32 %s4398_s19, 10  ;;  %s120_s5 = scalar_lea.vmem [#allocation4], %s3655_s27 }
  0x1b   : > { %s4475_s4 = scalar_lea.hbm %s4804_s2, %s3672_s28  ;;  %s127_s6 = sshll.u32 %s120_s5, 4  ;;  %s4477_s6 = int_to_ptr.vmem [resolvable:$true] %s127_s6 }
  0x1c   : > { %p4479_p13 = pnand %p4281_p11, %p59_p9  ;;  %s4484_s8 = scalar_lea.sflag [#allocation5], %s116_s26 }
  0x1d   : > { %s4332_s9 = scalar_lea.hbm %s4475_s4, 1024  ;;  %s4337_s12 = scalar_lea.hbm %s4804_s2, 2048 }
  0x1e   : > { %p4333_p1 = scmp.ne.s32.totalorder %s4475_s4, %s4332_s9  ;;  %p4334_p2 = pneg %p4479_p13 }
  0x1f   : > { %p4338_p5 = scmp.lt.u32.totalorder %s4475_s4, %s4804_s2  ;;  %p4339_p6 = scmp.lt.u32.totalorder %s4337_s12, %s4332_s9 }
  0x20   : > { %p4335_p3 = pnand %p4334_p2, %p4333_p1  ;;  %p4341_p8 = scmp.lt.u32.totalorder %s4332_s9, %s4475_s4 }
  0x21   : > { %p4340_p7 = por %p4339_p6, %p4338_p5 }
  0x22   : > { %p4336_p4 = pneg %p4335_p3 }
  0x23   : > { %p4342_p9 = por %p4341_p8, %p4340_p7 }
  0x25   : > { %p4343_p10 = pnand %p4342_p9, %p4336_p4 }
  0x27   : > { %4346 = shalt.err (!%p4343_p10)
}
  0x28   : > { %s4347_s15 = scalar_lea.vmem %s4477_s6, 1024  ;;  %s4401_s16 = smov [#allocation4]  }
  0x29   : > { %p4348_p11 = scmp.ne.s32.totalorder %s4477_s6, %s4347_s15  ;;  %s4352_s17 = sshll.u32 %s4401_s16, 4  ;;  %s4353_s17 = int_to_ptr.vmem [resolvable:$false] %s4352_s17 }
  0x2a   : > { %s4354_s22 = scalar_lea.vmem %s4353_s17, 2048  ;;  %p4355_p0 = scmp.lt.s32.totalorder %s4477_s6, %s4353_s17 }
  0x2b   : > { %p4350_p1 = pnand %p4348_p11, %p4334_p2  ;;  %p4356_p5 = scmp.lt.s32.totalorder %s4354_s22, %s4347_s15 }
  0x2d   : > { %p4351_p3 = pneg %p4350_p1  ;;  %p4357_p6 = por %p4356_p5, %p4355_p0 }
  0x2f   : > { %p4358_p7 = pnand %p4357_p6, %p4351_p3 }
  0x31   : > { %4361 = shalt.err (!%p4358_p7)
}
  0x32   : > { %s4402_s23 = smov 128   ;;  %s4403_s26 = smov 8  }
  0x33   : > { %4280 = dma.hbm_to_vmem [thread:$0]  (!%p4479_p13), %s4475_s4, 1024, %s4477_s6, %s4484_s8, %s4402_s23, %s4402_s23, %s4403_s26  }
  0x34   : > { %p135_p2 = scmp.lt.s32.totalorder %s4398_s19, 3  ;;  %p4808_p4 = scmp.ge.s32.totalorder %s4398_s19, 1 }
  0x36   : > { %p136_p8 = pnand %p4808_p4, %p135_p2 }
  0x37   : > { %s141_s27 = sand.u32 (!%p136_p8), 1, %s4390_s18  }
  0x38   : > { %139 = sbr.rel (%p136_p8) target bundleno = 1192 (0x4a8), region = 28  ;;  %s3659_s28 = sshll.u32 (!%p136_p8), %s141_s27, 6 }
  0x39   : > { %s142_s29 = scalar_lea.sflag (!%p136_p8), [#allocation5], %s141_s27  ;;  %s4516_s30 = scalar_lea.vmem (!%p136_p8), [#allocation4], %s3659_s28 }
  0x3f   : > { %4381 = dma.done.wait (%p4466_p12), %s142_s29, 1024  }
  0x40   : > { %4383 = vsyncadd (%p4466_p12), %s142_s29, 4294966272  ;;  %v173_v0 = vlaneseq  ;;  %s4523_s4 = sshll.u32 %s4449_s20, 9  ;;  %vm207_vm0 = vcmask 130048   ;;  %s4404_s25 = smov 12   ;;  %vm826_vm1 = vcmask 64512   ;;  %vm820_vm2 = vcmask 97280  }
  0x41   : > { %s188_s19 = sld [smem:[#allocation3 + %s4523_s4]]  ;;  %s189_s5 = sadd.s32 1, %s4523_s4  ;;  %vm822_vm3 = vcmask 195584   ;;  %vm824_vm4 = vcmask 293888   ;;  %vm1324_vm5 = vcmask 388096   ;;  %vm1322_vm6 = vcmask 392192  }
  0x42   : > { %v174_v1 = vand.u32 127, %v173_v0  ;;  %s190_s6 = sld [smem:[#allocation3 + %s189_s5]]  ;;  %v182_v4 = vshrl.u32 %v173_v0, 7  ;;  %s4405_s11 = smov 36  }
  0x43   : > { %s4406_s12 = smov 24   ;;  %s3675_s13 = sadd.s32 128, %s4523_s4 }
  0x44   : > { %v175_v2 = vcvt.s32.f32 %v174_v1  ;;  %v183_v10 = vadd.s32 8, %v182_v4  ;;  %v4538_v20 = vcvt.s32.f32 %v182_v4  ;;  %s1328_s14 = sld [smem:[#allocation3 + %s3675_s13]]  ;;  %s1329_s15 = sadd.s32 1, %s3675_s13 }
  0x45   : > { %s1330_s17 = sld [smem:[#allocation3 + %s1329_s15]]  ;;  %s3677_s27 = sadd.s32 256, %s4523_s4 }
  0x46   : > { %v176_v3 = vadd.f32 0.5, %v175_v2  ;;  %v4540_v21 = vcvt.s32.f32 %v183_v10  ;;  %v171_v2 = vld [vmem:[%s4803_s1] sm:$0xff]  ;;  %s2456_s28 = sld [smem:[#allocation3 + %s3677_s27]]  ;;  %s2457_s4 = sadd.s32 1, %s3677_s27 }
  0x47   : > { %s191_s8 = scvt.s32.f32 %s188_s19  ;;  %s2458_s19 = sld [smem:[#allocation3 + %s2457_s4]] }
  0x48   : > { %v177_v5 = vmul.f32 0.6666667, %v176_v3  ;;  %s202_s7 = scalar_lea.vmem %s4516_s30, %s190_s6 [#allocation4]  ;;  %v828_v3 = vsel %vm826_vm1, %v171_v2, 0  ;;  %p166_p12 = scmp.lt.s32.totalorder %s4449_s20, 1 }
  0x49   : > { %v203_v6 = vld [vmem:[%s202_s7] sm:$0xff]  ;;  %v204_v7 = vld [vmem:[%s202_s7 + $0x10] sm:$0xff]  ;;  %v192_v17 = vstv %s191_s8 }
  0x4a   : > { %v205_v8 = vld [vmem:[%s202_s7 + $0x20] sm:$0xff]  ;;  %v3661_v9 = vadd.f32 -0.5, %v177_v5  ;;  %v209_v11 = vsel %vm207_vm0, %v203_v6, 0  ;;  %v212_v13 = vsel %vm207_vm0, %v204_v7, 0  ;;  %v206_v16 = vld [vmem:[%s202_s7 + $0x30] sm:$0xff]  ;;  %v4575_v5 = vand.u32 4294901760, %v828_v3  ;;  %s1331_s16 = scvt.s32.f32 %s1328_s14 }
  0x4b   : > { %v4529_v12 = vand.u32 4294901760, %v209_v11  ;;  %v215_v15 = vsel %vm207_vm0, %v205_v8, 0  ;;  %v4542_v22 = vand.u32 4294901760, %v212_v13  ;;  %v218_v25 = vsel %vm207_vm0, %v206_v16, 0  ;;  %s1342_s22 = scalar_lea.vmem %s4516_s30, %s1330_s17 [#allocation4]  ;;  %s4814_s20 = smov (!%p166_p12, %s4449_s20), 1 }
  0x4c   : > { %v179_v14 = vmax.f32 %v3661_v9, 0.0  ;;  %v4545_v24 = vand.u32 4294901760, %v215_v15  ;;  %v4553_v31 = vand.u32 4294901760, %v218_v25  ;;  %3909 = vmatprep.mubr.f32.mxu1 %v4575_v5  ;;  %v4581_v7 = vsub.f32 %v828_v3, %v4575_v5  ;;  %v1343_v16 = vld [vmem:[%s1342_s22] sm:$0xff]  ;;  %s2459_s29 = scvt.s32.f32 %s2456_s28 }
  0x4d   : > { %v4534_v18 = vsub.f32 %v209_v11, %v4529_v12  ;;  %v298_v30 = vsub.f32 %v212_v13, %v4542_v22  ;;  %v1332_v11 = vstv %s1331_s16  ;;  %s2470_s5 = scalar_lea.vmem %s4516_s30, %s2458_s19 [#allocation4]  ;;  %s4274_s30 = smul.u32 48, %s4814_s20 }
  0x4e   : > { %v4536_v19 = vmin.f32 %v179_v14, 7.0  ;;  %v308_v33 = vsub.f32 %v215_v15, %v4545_v24  ;;  %v318_v39 = vsub.f32 %v218_v25, %v4553_v31  ;;  %v4584_v8 = vand.u32 4294901760, %v4581_v7  ;;  %v172_v15 = vld [vmem:[%s4803_s1 + $0x8] sm:$0xf]  ;;  %v1345_v25 = vld [vmem:[%s1342_s22 + $0x20] sm:$0xff] }
  0x4f   : > { %v289_v23 = vand.u32 4294901760, %v4534_v18  ;;  %v299_v38 = vand.u32 4294901760, %v298_v30  ;;  %s4740_s8 = scalar_lea.vmem %s4805_s3, %s4274_s30 }
  0x50   : > { %v193_v26 = vadd.f32 %v192_v17, %v4536_v19  ;;  %v309_v40 = vand.u32 4294901760, %v308_v33  ;;  %v319_v46 = vand.u32 4294901760, %v318_v39  ;;  %v902_v9 = vsub.f32 %v4581_v7, %v4584_v8 }
  0x51   : > { %v290_v27 = vsub.f32 %v4534_v18, %v289_v23  ;;  %v300_v45 = vsub.f32 %v298_v30, %v299_v38  ;;  %v831_v17 = vsel %vm826_vm1, %v172_v15, 0 }
  0x52   : > { %v194_v28 = vsub.f32 %v193_v26, %v4538_v20  ;;  %v195_v29 = vsub.f32 %v193_v26, %v4540_v21  ;;  %v310_v47 = vsub.f32 %v308_v33, %v309_v40  ;;  %v320_v52 = vsub.f32 %v318_v39, %v319_v46 }
  0x53   : > { %v291_v32 = vand.u32 4294901760, %v290_v27  ;;  %v301_v51 = vand.u32 4294901760, %v300_v45  ;;  %v4588_v10 = vand.u32 4294901760, %v902_v9  ;;  %v4601_v26 = vand.u32 4294901760, %v831_v17 }
  0x54   : > { %v196_v34 = vand.u32 2147483647, %v194_v28  ;;  %v197_v35 = vand.u32 2147483647, %v195_v29  ;;  %v311_v55 = vand.u32 4294901760, %v310_v47  ;;  %v321_v58 = vand.u32 4294901760, %v320_v52 }
  0x55   : > { %3846 = vmatprep.mubr.f32.mxu0 %v291_v32  ;;  %v4607_v32 = vsub.f32 %v831_v17, %v4601_v26 }
  0x56   : > { %v198_v36 = vsub.f32 1.0, %v196_v34  ;;  %v199_v37 = vsub.f32 1.0, %v197_v35 }
  0x57   : > { %v4614_v35 = vand.u32 4294901760, %v4607_v32 }
  0x58   : > { %v200_v41 = vmax.f32 %v198_v36, 0.0  ;;  %v201_v42 = vmax.f32 %v199_v37, 0.0  ;;  %v1346_v37 = vld [vmem:[%s1342_s22 + $0x30] sm:$0xff] }
  0x5a   : > { %v221_v43 = vand.u32 4294901760, %v200_v41  ;;  %v224_v44 = vand.u32 4294901760, %v201_v42 }
  0x5c   : > { %v4112_v48 = vpack.c.bf16 %v224_v44, %v221_v43  ;;  %v329_v49 = vsub.f32 %v200_v41, %v221_v43  ;;  %v336_v50 = vsub.f32 %v201_v42, %v224_v44  ;;  %v912_v42 = vsub.f32 %v4607_v32, %v4614_v35 }
  0x5e   : > { %4113 = vmatprep.subr.bf16.mxu0 %v4112_v48  ;;  %v330_v53 = vand.u32 4294901760, %v329_v49  ;;  %v337_v54 = vand.u32 4294901760, %v336_v50  ;;  %v4120_v62 = vpack.c.bf16 %v336_v50, %v329_v49 }
  0x5f   : > { %4115 = vmatpush3.bf16.msra.mxu0 %v4112_v48 }
  0x60   : > { %v331_v56 = vsub.f32 %v329_v49, %v330_v53  ;;  %v338_v57 = vsub.f32 %v336_v50, %v337_v54  ;;  %v4128_v63 = vpack.c.bf16 %v337_v54, %v330_v53 }
  0x62   : > { %3847 = vmatmul.mubr.f32.vlgmr.msra.gmra.mrb[0].mxu0 %v301_v51  ;;  %v332_v59 = vand.u32 4294901760, %v331_v56  ;;  %v339_v60 = vand.u32 4294901760, %v338_v57  ;;  %v4638_v57 = vand.u32 4294901760, %v912_v42 }
  0x63   : > { %3849 = vmatprep.mubr.f32.mxu0 %v311_v55 }
  0x64   : > { %v4116_v61 = vpack.c.bf16 %v339_v60, %v332_v59 }
  0x66   : > { %3850 = vmatmul.mubr.f32.gmra.mrb[2].mxu0 %v321_v58  ;;  %4117 = vmatprep.subr.bf16.mxu0 %v4116_v61 }
  0x67   : > { %4119 = vmatpush3.bf16.msra.mxu0 %v4116_v61  ;;  %3856 = vmatprep.mubr.f32.mxu0 %v4529_v12 }
  0x68   : > { %4121 = vmatprep.subr.bf16.mxu0 %v4120_v62 }
  0x6a   : > { %3857 = vmatmul.mubr.f32.vlgmr.msra.gmra.mrb[0].mxu0 %v4542_v22 }
  0x6b   : > { %3859 = vmatprep.mubr.f32.mxu0 %v4545_v24  ;;  %4123 = vmatpush3.bf16.msra.mxu0 %v4120_v62 }
  0x6c   : > { %4125 = vmatprep.subr.bf16.mxu0 %v4112_v48 }
  0x6e   : > { %3860 = vmatmul.mubr.f32.gmra.mrb[2].mxu0 %v4553_v31 }
  0x6f   : > { %3866 = vmatprep.mubr.f32.mxu0 %v4534_v18 }
  0x72   : > { %3867 = vmatmul.mubr.f32.vlgmr.msra.gmra.mrb[0].mxu0 %v298_v30 }
  0x73   : > { %3869 = vmatprep.mubr.f32.mxu0 %v308_v33  ;;  %4127 = vmatpush3.bf16.msra.mxu0 %v4112_v48  ;;  %v1354_v33 = vsel %vm207_vm0, %v1345_v25, 0  ;;  %v2460_v25 = vstv %s2459_s29 }
  0x74   : > { %4129 = vmatprep.subr.bf16.mxu0 %v4128_v63 }
  0x76   : > { %3870 = vmatmul.mubr.f32.gmra.mrb[2].mxu0 %v318_v39 }
  0x77   : > { %3876 = vmatprep.mubr.f32.mxu0 %v289_v23  ;;  %v1348_v23 = vsel %vm207_vm0, %v1343_v16, 0 }
  0x78   : > { %v4603_v29 = vand.u32 4294901760, %v1348_v23 }
  0x7a   : > { %3877 = vmatmul.mubr.f32.vlgmr.msra.gmra.mrb[0].mxu0 %v299_v38  ;;  %v4611_v34 = vsub.f32 %v1348_v23, %v4603_v29 }
  0x7b   : > { %3879 = vmatprep.mubr.f32.mxu0 %v309_v40  ;;  %4131 = vmatpush3.bf16.msra.mxu0 %v4128_v63  ;;  %v4618_v40 = vand.u32 4294901760, %v1354_v33 }
  0x7c   : > { %4133 = vmatprep.subr.bf16.mxu0 %v4112_v48  ;;  %v1428_v41 = vand.u32 4294901760, %v4611_v34 }
  0x7d   : > { %v4629_v47 = vsub.f32 %v1354_v33, %v4618_v40 }
  0x7e   : > { %3880 = vmatmul.mubr.f32.gmra.mrb[2].mxu0 %v319_v46  ;;  %v1357_v46 = vsel %vm207_vm0, %v1346_v37, 0 }
  0x7f   : > { %3886 = vmatprep.mubr.f32.mxu0 %v4529_v12  ;;  %v1448_v55 = vand.u32 4294901760, %v4629_v47  ;;  %v4640_v58 = vand.u32 4294901760, %v1357_v46 }
  0x81   : > { %v1449_v61 = vsub.f32 %v4629_v47, %v1448_v55 }
  0x82   : > { %3887 = vmatmul.mubr.f32.vlgmr.msra.gmra.mrb[0].mxu0 %v4542_v22 }
  0x83   : > { %3889 = vmatprep.mubr.f32.mxu0 %v4545_v24  ;;  %4135 = vmatpush3.bf16.msra.mxu0 %v4112_v48  ;;  %v1429_v48 = vsub.f32 %v4611_v34, %v1428_v41 }
  0x85   : > { %v1430_v60 = vand.u32 4294901760, %v1429_v48  ;;  %v2472_v48 = vld [vmem:[%s2470_s5 + $0x10] sm:$0xff] }
  0x86   : > { %3890 = vmatmul.mubr.f32.gmra.mrb[2].mxu0 %v4553_v31 }
  0x87   : > { %3896 = vmatprep.mubr.f32.mxu0 %v4529_v12  ;;  %v1333_v12 = vadd.f32 %v1332_v11, %v4536_v19 }
  0x89   : > { %v1334_v13 = vsub.f32 %v1333_v12, %v4538_v20  ;;  %v1335_v14 = vsub.f32 %v1333_v12, %v4540_v21 }
  0x8a   : > { %3897 = vmatmul.mubr.f32.vlgmr.msra.gmra.mrb[0].mxu0 %v4542_v22 }
  0x8b   : > { %3899 = vmatprep.mubr.f32.mxu0 %v4545_v24  ;;  %v1336_v18 = vand.u32 2147483647, %v1334_v13  ;;  %v1337_v22 = vand.u32 2147483647, %v1335_v14  ;;  %v1344_v24 = vld [vmem:[%s1342_s22 + $0x10] sm:$0xff] }
  0x8c   : > { %v1351_v30 = vsel %vm207_vm0, %v1344_v24, 0 }
  0x8d   : > { %v1338_v27 = vsub.f32 1.0, %v1336_v18  ;;  %v1339_v28 = vsub.f32 1.0, %v1337_v22  ;;  %v4616_v36 = vand.u32 4294901760, %v1351_v30 }
  0x8e   : > { %3900 = vmatmul.mubr.f32.gmra.mrb[2].mxu0 %v4553_v31 }
  0x8f   : > { %3904 = vmatprep.mubr.f32.mxu0 %v4588_v10  ;;  %v1340_v38 = vmax.f32 %v1338_v27, 0.0  ;;  %v1341_v39 = vmax.f32 %v1339_v28, 0.0  ;;  %v4624_v43 = vsub.f32 %v1351_v30, %v4616_v36  ;;  %v2461_v27 = vadd.f32 %v2460_v25, %v4536_v19 }
  0x91   : > { %v1438_v51 = vand.u32 4294901760, %v4624_v43  ;;  %v1360_v53 = vand.u32 4294901760, %v1340_v38  ;;  %v1363_v54 = vand.u32 4294901760, %v1341_v39  ;;  %v2462_v30 = vsub.f32 %v2461_v27, %v4538_v20 }
  0x93   : > { %v1439_v59 = vsub.f32 %v4624_v43, %v1438_v51  ;;  %v4648_v63 = vpack.c.bf16 %v1363_v54, %v1360_v53  ;;  %v1468_v13 = vsub.f32 %v1340_v38, %v1360_v53  ;;  %v1475_v14 = vsub.f32 %v1341_v39, %v1363_v54  ;;  %v2474_v54 = vld [vmem:[%s2470_s5 + $0x30] sm:$0xff] }
  0x94   : > { %v2464_v33 = vand.u32 2147483647, %v2462_v30 }
  0x95   : > { %v1440_v3 = vand.u32 4294901760, %v1439_v59  ;;  %v1469_v15 = vand.u32 4294901760, %v1468_v13  ;;  %v1476_v16 = vand.u32 4294901760, %v1475_v14  ;;  %v4144_v28 = vpack.c.bf16 %v1475_v14, %v1468_v13 }
  0x96   : > { %v2466_v19 = vsub.f32 1.0, %v2464_v33 }
  0x97   : > { %v1470_v17 = vsub.f32 %v1468_v13, %v1469_v15  ;;  %v1477_v18 = vsub.f32 %v1475_v14, %v1476_v16 }
  0x98   : > { %v2468_v38 = vmax.f32 %v2466_v19, 0.0 }
  0x99   : > { %v1471_v22 = vand.u32 4294901760, %v1470_v17  ;;  %v1478_v23 = vand.u32 4294901760, %v1477_v18 }
  0x9a   : > { %v2488_v42 = vand.u32 4294901760, %v2468_v38 }
  0x9b   : > { %v4140_v24 = vpack.c.bf16 %v1478_v23, %v1471_v22 }
 0x15d   : > { %v3898_v0 = vpop.f32.mrb[0].mxu0 }
 0x15e   : > { %809 = vrot.lane.b32.xlu0 %v3898_v0, %s4404_s25  ;;  %v786_v1 = vpop.f32.mrb[1].mxu0  ;;  %v4651_v0 = vsub.f32 %v1357_v46, %v4640_v58 }
 0x160   : > { %v1458_v2 = vand.u32 4294901760, %v4651_v0 }
 0x161   : > { %v3901_v4 = vpop.f32.mrb[2].mxu0 }
 0x162   : > { %817 = vrot.lane.b32.xlu1 %v3901_v4, %s4405_s11  ;;  %v798_v6 = vpop.f32.mrb[3].mxu0  ;;  %v1450_v4 = vand.u32 4294901760, %v1449_v61  ;;  %v1459_v9 = vsub.f32 %v4651_v0, %v1458_v2 }
 0x163   : > { %813 = vrot.lane.b32.xlu0 %v798_v6, %s4406_s12 }
 0x164   : > { %v1460_v12 = vand.u32 4294901760, %v1459_v9 }
 0x1d0   : > { %v810_v31 = vpop.permute.xlu0 %809 }
 0x1d1   : > { %v821_v44 = vsel %vm820_vm2, %v786_v1, %v810_v31  ;;  %v2463_v31 = vsub.f32 %v2461_v27, %v4540_v21  ;;  %v4152_v21 = vpack.c.bf16 %v1476_v16, %v1469_v15 }
 0x1d3   : > { %v2465_v37 = vand.u32 2147483647, %v2463_v31 }
 0x1d4   : > { %v818_v49 = vpop.permute.xlu1 %817 }
 0x1d5   : > { %v814_v45 = vpop.permute.xlu0 %813  ;;  %v2467_v20 = vsub.f32 1.0, %v2465_v37 }
 0x1d6   : > { %v823_v50 = vsel %vm822_vm3, %v821_v44, %v814_v45  ;;  %v2471_v45 = vld [vmem:[%s2470_s5] sm:$0xff] }
 0x1d7   : > { %v825_v52 = vsel %vm824_vm4, %v823_v50, %v818_v49  ;;  %v2469_v39 = vmax.f32 %v2467_v20, 0.0  ;;  %v2476_v46 = vsel %vm207_vm0, %v2471_v45, 0  ;;  %v4688_v49 = vsub.f32 %v2468_v38, %v2488_v42 }
 0x1d8   : > { %v834_v56 = vand.u32 4294901760, %v825_v52  ;;  %v4696_v53 = vand.u32 4294901760, %v2476_v46 }
 0x1d9   : > { %v2491_v44 = vand.u32 4294901760, %v2469_v39 }
 0x1da   : > { %v921_v62 = vsub.f32 %v825_v52, %v834_v56  ;;  %3902 = vmatprep.subr.mxu0 %v834_v56  ;;  %v2473_v52 = vld [vmem:[%s2470_s5 + $0x20] sm:$0xff] }
 0x1db   : > { %3903 = vmatpush3.msra.mxu0 %v834_v56  ;;  %v4690_v50 = vsub.f32 %v2469_v39, %v2491_v44 }
 0x1dc   : > { %v922_v1 = vand.u32 4294901760, %v921_v62  ;;  %3905 = vmatmul.mubr.f32.vlgmr.msra.gmra.mrb[4].mxu0 %v4638_v57  ;;  %4137 = vmatprep.subr.bf16.mxu0 %v4648_v63 }
 0x1dd   : > { %4139 = vmatpush3.bf16.msra.mxu0 %v4648_v63  ;;  %3936 = vmatprep.mubr.f32.mxu0 %v1430_v60  ;;  %v2604_v59 = vand.u32 4294901760, %v4690_v50  ;;  %v4160_v60 = vpack.c.bf16 %v2491_v44, %v2488_v42 }
 0x1de   : > { %v923_v6 = vsub.f32 %v921_v62, %v922_v1 }
 0x1e0   : > { %v924_v11 = vand.u32 4294901760, %v923_v6  ;;  %3937 = vmatmul.mubr.f32.vlgmr.msra.gmra.mrb[6].mxu0 %v1440_v3 }
 0x1e1   : > { %3939 = vmatprep.mubr.f32.mxu0 %v1450_v4 }
 0x1e2   : > { %3907 = vmatprep.subr.mxu1 %v924_v11 }
 0x1e3   : > { %3908 = vmatpush3.msra.mxu1 %v924_v11 }
 0x1e4   : > { %3910 = vmatmul.mubr.f32.vlgmr.msra.gmra.mrb[0].mxu1 %v4601_v26  ;;  %3912 = vmatprep.subr.mxu1 %v921_v62 }
 0x1e5   : > { %3913 = vmatpush3.msra.mxu1 %v921_v62  ;;  %3914 = vmatprep.mubr.f32.mxu1 %v4581_v7  ;;  %v2605_v62 = vsub.f32 %v4690_v50, %v2604_v59 }
 0x1e6   : > { %3917 = vmatprep.subr.mxu1 %v834_v56  ;;  %3940 = vmatmul.mubr.f32.gmra.mrb[8].mxu0 %v1460_v12 }
 0x1e7   : > { %3994 = vmatprep.mubr.f32.mxu0 %v4588_v10  ;;  %v2606_v6 = vand.u32 4294901760, %v2605_v62 }
 0x1ec   : > { %3915 = vmatmul.mubr.f32.vlgmr.msra.gmra.mrb[0].mxu1 %v4607_v32 }
 0x1ed   : > { %3918 = vmatpush3.msra.mxu1 %v834_v56  ;;  %3919 = vmatprep.mubr.f32.mxu1 %v4584_v8 }
 0x1ee   : > { %3922 = vmatprep.subr.mxu1 %v922_v1 }
 0x1f4   : > { %3920 = vmatmul.mubr.f32.vlgmr.msra.gmra.mrb[0].mxu1 %v4614_v35 }
 0x1f5   : > { %3923 = vmatpush3.msra.mxu1 %v922_v1  ;;  %3924 = vmatprep.mubr.f32.mxu1 %v4575_v5 }
 0x1f6   : > { %3927 = vmatprep.subr.mxu1 %v834_v56 }
 0x1fc   : > { %3925 = vmatmul.mubr.f32.vlgmr.msra.gmra.mrb[0].mxu1 %v4601_v26 }
 0x1fd   : > { %3928 = vmatpush3.msra.mxu1 %v834_v56  ;;  %3929 = vmatprep.mubr.f32.mxu1 %v4575_v5  ;;  %v2597_v56 = vand.u32 4294901760, %v4688_v49 }
 0x1fe   : > { %4141 = vmatprep.subr.bf16.mxu1 %v4140_v24 }
 0x1ff   : > { %v2598_v61 = vsub.f32 %v4688_v49, %v2597_v56 }
 0x201   : > { %v2599_v4 = vand.u32 4294901760, %v2598_v61 }
 0x203   : > { %v4164_v14 = vpack.c.bf16 %v2606_v6, %v2599_v4 }
 0x204   : > { %3930 = vmatmul.mubr.f32.vlgmr.msra.gmra.mrb[0].mxu1 %v4601_v26 }
 0x205   : > { %4143 = vmatpush3.bf16.msra.mxu1 %v4140_v24  ;;  %3946 = vmatprep.mubr.f32.mxu1 %v4603_v29 }
 0x206   : > { %4145 = vmatprep.subr.bf16.mxu1 %v4144_v28 }
 0x208   : > { %3947 = vmatmul.mubr.f32.vlgmr.msra.gmra.mrb[2].mxu1 %v4616_v36 }
 0x209   : > { %3949 = vmatprep.mubr.f32.mxu1 %v4618_v40  ;;  %4147 = vmatpush3.bf16.msra.mxu1 %v4144_v28 }
 0x20a   : > { %4149 = vmatprep.subr.bf16.mxu1 %v4648_v63 }
 0x20c   : > { %3950 = vmatmul.mubr.f32.gmra.mrb[4].mxu1 %v4640_v58 }
 0x20d   : > { %3956 = vmatprep.mubr.f32.mxu1 %v4611_v34  ;;  %v2479_v34 = vsel %vm207_vm0, %v2472_v48, 0 }
 0x210   : > { %3957 = vmatmul.mubr.f32.vlgmr.msra.gmra.mrb[2].mxu1 %v4624_v43  ;;  %v4705_v43 = vand.u32 4294901760, %v2479_v34 }
 0x211   : > { %3959 = vmatprep.mubr.f32.mxu1 %v4629_v47  ;;  %4151 = vmatpush3.bf16.msra.mxu1 %v4648_v63  ;;  %v2555_v47 = vsub.f32 %v2476_v46, %v4696_v53 }
 0x212   : > { %4153 = vmatprep.subr.bf16.mxu1 %v4152_v21 }
 0x214   : > { %3960 = vmatmul.mubr.f32.gmra.mrb[4].mxu1 %v4651_v0  ;;  %v2565_v0 = vsub.f32 %v2479_v34, %v4705_v43 }
 0x215   : > { %3966 = vmatprep.mubr.f32.mxu1 %v1428_v41  ;;  %v2482_v41 = vsel %vm207_vm0, %v2473_v52, 0 }
 0x216   : > { %v2566_v9 = vand.u32 4294901760, %v2565_v0 }
 0x218   : > { %3967 = vmatmul.mubr.f32.vlgmr.msra.gmra.mrb[2].mxu1 %v1438_v51  ;;  %v4709_v51 = vand.u32 4294901760, %v2482_v41  ;;  %v2567_v15 = vsub.f32 %v2565_v0, %v2566_v9 }
 0x219   : > { %3969 = vmatprep.mubr.f32.mxu1 %v1448_v55  ;;  %4155 = vmatpush3.bf16.msra.mxu1 %v4152_v21  ;;  %v2485_v55 = vsel %vm207_vm0, %v2474_v54, 0 }
 0x21a   : > { %4157 = vmatprep.subr.bf16.mxu1 %v4648_v63  ;;  %v2584_v1 = vand.u32 4294901760, %v2485_v55  ;;  %v2575_v3 = vsub.f32 %v2482_v41, %v4709_v51  ;;  %v2568_v18 = vand.u32 4294901760, %v2567_v15 }
 0x21c   : > { %3970 = vmatmul.mubr.f32.gmra.mrb[4].mxu1 %v1458_v2  ;;  %v2556_v2 = vand.u32 4294901760, %v2555_v47  ;;  %v2585_v11 = vsub.f32 %v2485_v55, %v2584_v1  ;;  %v2576_v13 = vand.u32 4294901760, %v2575_v3 }
 0x21d   : > { %3976 = vmatprep.mubr.f32.mxu1 %v4603_v29 }
 0x21e   : > { %v2557_v12 = vsub.f32 %v2555_v47, %v2556_v2  ;;  %v2586_v16 = vand.u32 4294901760, %v2585_v11  ;;  %v2577_v17 = vsub.f32 %v2575_v3, %v2576_v13 }
 0x220   : > { %3977 = vmatmul.mubr.f32.vlgmr.msra.gmra.mrb[2].mxu1 %v4616_v36  ;;  %v2587_v22 = vsub.f32 %v2585_v11, %v2586_v16  ;;  %v2578_v23 = vand.u32 4294901760, %v2577_v17 }
 0x221   : > { %3979 = vmatprep.mubr.f32.mxu1 %v4618_v40  ;;  %4159 = vmatpush3.bf16.msra.mxu1 %v4648_v63  ;;  %v2558_v63 = vand.u32 4294901760, %v2557_v12 }
 0x222   : > { %4161 = vmatprep.subr.bf16.mxu1 %v4160_v60  ;;  %v2588_v24 = vand.u32 4294901760, %v2587_v22 }
 0x224   : > { %3980 = vmatmul.mubr.f32.gmra.mrb[4].mxu1 %v4640_v58 }
 0x225   : > { %3986 = vmatprep.mubr.f32.mxu1 %v4603_v29  ;;  %v4168_v29 = vpack.c.bf16 %v4690_v50, %v4688_v49 }
 0x228   : > { %3987 = vmatmul.mubr.f32.vlgmr.msra.gmra.mrb[2].mxu1 %v4616_v36  ;;  %v4176_v36 = vpack.c.bf16 %v2604_v59, %v2597_v56 }
 0x229   : > { %3989 = vmatprep.mubr.f32.mxu1 %v4618_v40  ;;  %4163 = vmatpush3.bf16.msra.mxu1 %v4160_v60 }
 0x22a   : > { %4165 = vmatprep.subr.bf16.mxu1 %v4164_v14 }
 0x22c   : > { %3990 = vmatmul.mubr.f32.gmra.mrb[4].mxu1 %v4640_v58 }
 0x22d   : > { %4026 = vmatprep.mubr.f32.mxu1 %v2558_v63 }
 0x230   : > { %4027 = vmatmul.mubr.f32.vlgmr.msra.gmra.mrb[6].mxu1 %v2568_v18 }
 0x231   : > { %4029 = vmatprep.mubr.f32.mxu1 %v2578_v23  ;;  %4167 = vmatpush3.bf16.msra.mxu1 %v4164_v14 }
 0x232   : > { %4169 = vmatprep.subr.bf16.mxu1 %v4168_v29 }
 0x234   : > { %4030 = vmatmul.mubr.f32.gmra.mrb[8].mxu1 %v2588_v24 }
 0x235   : > { %4036 = vmatprep.mubr.f32.mxu1 %v4696_v53 }
 0x238   : > { %4037 = vmatmul.mubr.f32.vlgmr.msra.gmra.mrb[6].mxu1 %v4705_v43 }
 0x239   : > { %4039 = vmatprep.mubr.f32.mxu1 %v4709_v51  ;;  %4171 = vmatpush3.bf16.msra.mxu1 %v4168_v29 }
 0x23a   : > { %4173 = vmatprep.subr.bf16.mxu1 %v4160_v60 }
 0x23c   : > { %4040 = vmatmul.mubr.f32.gmra.mrb[8].mxu1 %v2584_v1 }
 0x23d   : > { %4046 = vmatprep.mubr.f32.mxu1 %v2555_v47 }
 0x240   : > { %4047 = vmatmul.mubr.f32.vlgmr.msra.gmra.mrb[6].mxu1 %v2565_v0 }
 0x241   : > { %4049 = vmatprep.mubr.f32.mxu1 %v2575_v3  ;;  %4175 = vmatpush3.bf16.msra.mxu1 %v4160_v60 }
 0x242   : > { %4177 = vmatprep.subr.bf16.mxu1 %v4176_v36 }
 0x244   : > { %4050 = vmatmul.mubr.f32.gmra.mrb[8].mxu1 %v2585_v11 }
 0x245   : > { %4056 = vmatprep.mubr.f32.mxu1 %v2556_v2 }
 0x248   : > { %4057 = vmatmul.mubr.f32.vlgmr.msra.gmra.mrb[6].mxu1 %v2566_v9 }
 0x249   : > { %4059 = vmatprep.mubr.f32.mxu1 %v2576_v13  ;;  %4179 = vmatpush3.bf16.msra.mxu1 %v4176_v36 }
 0x24a   : > { %4181 = vmatprep.subr.bf16.mxu1 %v4160_v60 }
 0x24c   : > { %4060 = vmatmul.mubr.f32.gmra.mrb[8].mxu1 %v2586_v16 }
 0x24d   : > { %4066 = vmatprep.mubr.f32.mxu1 %v4696_v53 }
 0x250   : > { %4067 = vmatmul.mubr.f32.vlgmr.msra.gmra.mrb[6].mxu1 %v4705_v43 }
 0x251   : > { %4069 = vmatprep.mubr.f32.mxu1 %v4709_v51  ;;  %4183 = vmatpush3.bf16.msra.mxu1 %v4160_v60 }
 0x254   : > { %4070 = vmatmul.mubr.f32.gmra.mrb[8].mxu1 %v2584_v1 }
 0x255   : > { %4076 = vmatprep.mubr.f32.mxu1 %v4696_v53 }
 0x258   : > { %4077 = vmatmul.mubr.f32.vlgmr.msra.gmra.mrb[6].mxu1 %v4705_v43 }
 0x259   : > { %4079 = vmatprep.mubr.f32.mxu1 %v4709_v51 }
 0x25c   : > { %4080 = vmatmul.mubr.f32.gmra.mrb[8].mxu1 %v2584_v1 }
 0x2af   : > { %v3906_v40 = vpop.f32.mrb[4].mxu0 }
 0x2b0   : > { %v905_v58 = vpop.f32.mrb[5].mxu0 }
 0x2b3   : > { %v3938_v25 = vpop.f32.mrb[6].mxu0 }
 0x2b4   : > { %v1432_v27 = vpop.f32.mrb[7].mxu0 }
 0x2b9   : > { %v3941_v28 = vpop.f32.mrb[8].mxu0 }
 0x2ba   : > { %v1452_v30 = vpop.f32.mrb[9].mxu0 }
 0x2d7   : > { %v3931_v31 = vpop.f32.mrb[0].mxu1 }
 0x2d8   : > { %v4184_v33 = vadd.f32 %v3931_v31, %v3906_v40  ;;  %v1312_v37 = vpop.f32.mrb[1].mxu1 }
 0x2d9   : > { %v4185_v19 = vadd.f32 %v1312_v37, %v905_v58 }
 0x2da   : > { %1325 = vst.msk [vmem:[%s4740_s8 + $0x8] sm:$0xf] %vm1324_vm5, %v4184_v33 }
 0x2db   : > { %1323 = vst.msk [vmem:[%s4740_s8] sm:$0xff] %vm1322_vm6, %v4185_v19 }
 0x2fb   : > { %v3988_v20 = vpop.f32.mrb[2].mxu1 }
 0x2fc   : > { %v4186_v21 = vadd.f32 %v3988_v20, %v3938_v25  ;;  %v1925_v38 = vpop.f32.mrb[3].mxu1 }
 0x2fd   : > { %v4187_v39 = vadd.f32 %v1925_v38, %v1432_v27 }
 0x2fe   : > { %1948 = vrot.lane.b32.xlu1 %v4186_v21, %s4404_s25 }
 0x2ff   : > { %v3991_v42 = vpop.f32.mrb[4].mxu1 }
 0x300   : > { %v4188_v44 = vadd.f32 %v3991_v42, %v3941_v28  ;;  %v1937_v45 = vpop.f32.mrb[5].mxu1 }
 0x301   : > { %v4189_v46 = vadd.f32 %v1937_v45, %v1452_v30 }
 0x302   : > { %1956 = vrot.lane.b32.xlu1 %v4188_v44, %s4405_s11 }
 0x303   : > { %1952 = vrot.lane.b32.xlu0 %v4189_v46, %s4406_s12 }
 0x32b   : > { %v4078_v48 = vpop.f32.mrb[6].mxu1 }
 0x32c   : > { %v3053_v49 = vpop.f32.mrb[7].mxu1  ;;  %3076 = vrot.lane.b32.xlu0 %v4078_v48, %s4404_s25 }
 0x32f   : > { %v4081_v50 = vpop.f32.mrb[8].mxu1 }
 0x330   : > { %v3065_v52 = vpop.f32.mrb[9].mxu1  ;;  %3084 = vrot.lane.b32.xlu0 %v4081_v50, %s4405_s11 }
 0x331   : > { %3080 = vrot.lane.b32.xlu1 %v3065_v52, %s4406_s12 }
 0x370   : > { %v1949_v53 = vpop.permute.xlu1 %1948 }
 0x371   : > { %v1959_v34 = vsel %vm820_vm2, %v4187_v39, %v1949_v53 }
 0x374   : > { %v1957_v54 = vpop.permute.xlu1 %1956 }
 0x375   : > { %v1953_v41 = vpop.permute.xlu0 %1952 }
 0x376   : > { %v1960_v56 = vsel %vm822_vm3, %v1959_v34, %v1953_v41 }
 0x377   : > { %v1961_v59 = vsel %vm824_vm4, %v1960_v56, %v1957_v54 }
 0x378   : > { %v1963_v43 = vand.u32 4294901760, %v1961_v59 }
 0x37a   : > { %v2050_v47 = vsub.f32 %v1961_v59, %v1963_v43  ;;  %3992 = vmatprep.subr.mxu0 %v1963_v43 }
 0x37b   : > { %3993 = vmatpush3.msra.mxu0 %v1963_v43 }
 0x37c   : > { %3995 = vmatmul.mubr.f32.vlgmr.msra.gmra.mrb[10].mxu0 %v4638_v57  ;;  %v2051_v51 = vand.u32 4294901760, %v2050_v47 }
 0x37d   : > { %3999 = vmatprep.mubr.f32.mxu0 %v4575_v5 }
 0x37e   : > { %v2052_v55 = vsub.f32 %v2050_v47, %v2051_v51 }
 0x380   : > { %v2053_v60 = vand.u32 4294901760, %v2052_v55 }
 0x382   : > { %3997 = vmatprep.subr.mxu0 %v2053_v60 }
 0x383   : > { %3998 = vmatpush3.msra.mxu0 %v2053_v60 }
 0x384   : > { %4000 = vmatmul.mubr.f32.vlgmr.msra.gmra.mrb[10].mxu0 %v4601_v26  ;;  %4002 = vmatprep.subr.mxu0 %v2050_v47 }
 0x385   : > { %4003 = vmatpush3.msra.mxu0 %v2050_v47  ;;  %4004 = vmatprep.mubr.f32.mxu0 %v4581_v7 }
 0x386   : > { %4007 = vmatprep.subr.mxu0 %v1963_v43 }
 0x38c   : > { %4005 = vmatmul.mubr.f32.vlgmr.msra.gmra.mrb[10].mxu0 %v4607_v32 }
 0x38d   : > { %4008 = vmatpush3.msra.mxu0 %v1963_v43  ;;  %4009 = vmatprep.mubr.f32.mxu0 %v4584_v8 }
 0x38e   : > { %4012 = vmatprep.subr.mxu0 %v2051_v51 }
 0x394   : > { %4010 = vmatmul.mubr.f32.vlgmr.msra.gmra.mrb[10].mxu0 %v4614_v35 }
 0x395   : > { %4013 = vmatpush3.msra.mxu0 %v2051_v51  ;;  %4014 = vmatprep.mubr.f32.mxu0 %v4575_v5 }
 0x396   : > { %4017 = vmatprep.subr.mxu0 %v1963_v43 }
 0x39c   : > { %4015 = vmatmul.mubr.f32.vlgmr.msra.gmra.mrb[10].mxu0 %v4601_v26 }
 0x39d   : > { %4018 = vmatpush3.msra.mxu0 %v1963_v43  ;;  %4019 = vmatprep.mubr.f32.mxu0 %v4575_v5 }
 0x39e   : > { %v3077_v61 = vpop.permute.xlu0 %3076 }
 0x39f   : > { %v3087_v62 = vsel %vm820_vm2, %v3053_v49, %v3077_v61 }
 0x3a2   : > { %v3085_v1 = vpop.permute.xlu0 %3084 }
 0x3a3   : > { %v3081_v0 = vpop.permute.xlu1 %3080 }
 0x3a4   : > { %v3088_v2 = vsel %vm822_vm3, %v3087_v62, %v3081_v0  ;;  %4020 = vmatmul.mubr.f32.vlgmr.msra.gmra.mrb[10].mxu0 %v4601_v26 }
 0x3a5   : > { %v3089_v3 = vsel %vm824_vm4, %v3088_v2, %v3085_v1  ;;  %4084 = vmatprep.mubr.f32.mxu0 %v4588_v10 }
 0x3a6   : > { %v3091_v4 = vand.u32 4294901760, %v3089_v3 }
 0x3a8   : > { %v3178_v6 = vsub.f32 %v3089_v3, %v3091_v4  ;;  %4082 = vmatprep.subr.mxu0 %v3091_v4 }
 0x3a9   : > { %4083 = vmatpush3.msra.mxu0 %v3091_v4 }
 0x3aa   : > { %4085 = vmatmul.mubr.f32.vlgmr.msra.gmra.mrb[12].mxu0 %v4638_v57  ;;  %v3179_v9 = vand.u32 4294901760, %v3178_v6 }
 0x3ab   : > { %4089 = vmatprep.mubr.f32.mxu0 %v4575_v5 }
 0x3ac   : > { %v3180_v11 = vsub.f32 %v3178_v6, %v3179_v9 }
 0x3ae   : > { %v3181_v12 = vand.u32 4294901760, %v3180_v11 }
 0x3b0   : > { %4087 = vmatprep.subr.mxu0 %v3181_v12 }
 0x3b1   : > { %4088 = vmatpush3.msra.mxu0 %v3181_v12 }
 0x3b2   : > { %4090 = vmatmul.mubr.f32.vlgmr.msra.gmra.mrb[12].mxu0 %v4601_v26  ;;  %4092 = vmatprep.subr.mxu0 %v3178_v6 }
 0x3b3   : > { %4093 = vmatpush3.msra.mxu0 %v3178_v6  ;;  %4094 = vmatprep.mubr.f32.mxu0 %v4581_v7 }
 0x3b4   : > { %4097 = vmatprep.subr.mxu0 %v3091_v4 }
 0x3ba   : > { %4095 = vmatmul.mubr.f32.vlgmr.msra.gmra.mrb[12].mxu0 %v4607_v32 }
 0x3bb   : > { %4098 = vmatpush3.msra.mxu0 %v3091_v4  ;;  %4099 = vmatprep.mubr.f32.mxu0 %v4584_v8 }
 0x3bc   : > { %4102 = vmatprep.subr.mxu0 %v3179_v9 }
 0x3c2   : > { %4100 = vmatmul.mubr.f32.vlgmr.msra.gmra.mrb[12].mxu0 %v4614_v35 }
 0x3c3   : > { %4103 = vmatpush3.msra.mxu0 %v3179_v9  ;;  %4104 = vmatprep.mubr.f32.mxu0 %v4575_v5 }
 0x3c4   : > { %4107 = vmatprep.subr.mxu0 %v3091_v4 }
 0x3ca   : > { %4105 = vmatmul.mubr.f32.vlgmr.msra.gmra.mrb[12].mxu0 %v4601_v26 }
 0x3cb   : > { %4108 = vmatpush3.msra.mxu0 %v3091_v4  ;;  %4109 = vmatprep.mubr.f32.mxu0 %v4575_v5 }
 0x3d2   : > { %4110 = vmatmul.mubr.f32.vlgmr.msra.gmra.mrb[12].mxu0 %v4601_v26 }
 0x477   : > { %v4021_v7 = vpop.f32.mrb[10].mxu0 }
 0x478   : > { %3666 = vst.msk [vmem:[%s4740_s8 + $0x18] sm:$0xf] %vm1324_vm5, %v4021_v7  ;;  %v2441_v10 = vpop.f32.mrb[11].mxu0 }
 0x479   : > { %3665 = vst.msk [vmem:[%s4740_s8 + $0x10] sm:$0xff] %vm1322_vm6, %v2441_v10 }
 0x4a5   : > { %v4111_v8 = vpop.f32.mrb[12].mxu0 }
 0x4a6   : > { %3669 = vst.msk [vmem:[%s4740_s8 + $0x28] sm:$0xf] %vm1324_vm5, %v4111_v8  ;;  %v3569_v32 = vpop.f32.mrb[13].mxu0 }
 0x4a7   : > { %3668 = vst.msk [vmem:[%s4740_s8 + $0x20] sm:$0xff] %vm1322_vm6, %v3569_v32 }
 0x4a8 PF: > { %p19_p13 = scmp.ge.s32.totalorder %s4452_s21, 4   ;;  %s4809_s17 = smov %s4390_s18 }
 0x4a9   : > { %s4810_s18 = smov %s4394_s0  ;;  %s4811_s0 = smov %s4462_s24 }
 0x4aa   : > { %s4812_s19 = smov %s4452_s21  ;;  %21 = sbr.rel (!%p19_p13) target bundleno = 18 (0x12), region = 73 }
 0x4b1   :  { %3603 = vsyncpa [#allocation5], 1 }
 0x4b2   :  { %3605 = vsyncpa [#allocation5 + $0x1], 1 }

</bundles_post_ra>
